<compile_context>
chip_gen: v7x
topology: tpu7x:2x2x1
jax: 0.10.0
libtpu: 0.0.40
codegen_flags: <defaults>
</compile_context>

<pallas_src>
import functools
import math

import jax
import jax.numpy as jnp
from jax.experimental import pallas as pl
from jax.experimental.pallas import tpu as pltpu


# ---------------------------------------------------------------------------
# Kernel A: per (batch, seq-tile) projections, RoPE, final_q / final_k build.
# ---------------------------------------------------------------------------
def _proj_kernel(x_ref, scale_ref, wdq_ref, wuq_ref, wdkvn_ref, wdkvr_ref,
                 wuk_ref, wuv_ref, cos_ref, sin_ref,
                 qf_out, kf_out, v_out, kvd_out,
                 *, eps, H, HD, NR, R, Rh, sm_scale, cdt):
    x = x_ref[0].astype(jnp.float32)                          # (tS, D)

    # RMSNorm (pre-norm) in f32.
    ms = jnp.mean(x * x, axis=-1, keepdims=True)
    x_norm = x * jax.lax.rsqrt(ms + eps) * scale_ref[...]
    xb = x_norm.astype(cdt)

    c = cos_ref[...]                                          # (tS, Rh)
    s = sin_ref[...]

    # --- queries: two-stage (LoRA-style) projection, per-head RoPE + scale ---
    q_down = jnp.dot(xb, wdq_ref[...], preferred_element_type=jnp.float32)
    q_up = jnp.dot(q_down.astype(cdt), wuq_ref[...],
                   preferred_element_type=jnp.float32) * sm_scale
    q_parts = []
    for h in range(H):                                        # static unroll
        base = h * HD
        q_nr = q_up[:, base:base + NR]
        qr = q_up[:, base + NR:base + HD]
        x1 = qr[:, :Rh]
        x2 = qr[:, Rh:]
        q_parts.append(q_nr)
        q_parts.append(jnp.concatenate([x1 * c - x2 * s, x2 * c + x1 * s], -1))
    qf_out[0] = jnp.concatenate(q_parts, axis=-1).astype(cdt)  # (tS, D)

    # --- KV down-projection (pre-split, lane-dense weights) ---
    kv_nr = jnp.dot(xb, wdkvn_ref[...], preferred_element_type=jnp.float32)
    k_rope = jnp.dot(xb, wdkvr_ref[...], preferred_element_type=jnp.float32)
    # kv_down cache written once from the kernel (no wrapper concat).
    kvd_out[0] = jnp.concatenate([kv_nr, k_rope], axis=-1)     # (tS, KVP+R) f32

    # Shared roped k_rope vector (half-split rotation, once for all heads).
    x1 = k_rope[:, :Rh]
    x2 = k_rope[:, Rh:]
    kr_rot = jnp.concatenate([x1 * c - x2 * s, x2 * c + x1 * s], axis=-1)

    # --- KV up-projection; final_k = per-head [key_h ‖ roped k_rope] ---
    kvb = kv_nr.astype(cdt)
    key = jnp.dot(kvb, wuk_ref[...], preferred_element_type=jnp.float32)
    k_parts = []
    for h in range(H):
        k_parts.append(key[:, h * NR:(h + 1) * NR])
        k_parts.append(kr_rot)
    kf_out[0] = jnp.concatenate(k_parts, axis=-1).astype(cdt)  # (tS, D)

    v_out[0] = jnp.dot(kvb, wuv_ref[...],
                       preferred_element_type=jnp.float32).astype(cdt)


# ---------------------------------------------------------------------------
# Kernel B: causal flash attention over (batch, q-tile, kv-tile); heads inside.
# ---------------------------------------------------------------------------
def _flash_kernel(qf_ref, kf_ref, v_ref, o_ref, m_s, l_s, acc_s,
                  *, tq, tk, H, HD, cdt):
    qi = pl.program_id(1)
    ki = pl.program_id(2)

    @pl.when(ki == 0)
    def _init():
        m_s[...] = jnp.full(m_s.shape, -1e30, jnp.float32)
        l_s[...] = jnp.zeros(l_s.shape, jnp.float32)
        acc_s[...] = jnp.zeros(acc_s.shape, jnp.float32)

    # Skip KV tiles entirely above the causal diagonal (their DMAs are also
    # skipped via the clamped index_map in the wrapper).
    @pl.when(ki * tk < (qi + 1) * tq)
    def _compute():
        q = qf_ref[0]                                          # (tq, D) roped+scaled
        k = kf_ref[0]                                          # (tk, D) final_k
        v = v_ref[0]                                           # (tk, D)

        # Causal bias computed once per tile and shared across heads.
        rows = jax.lax.broadcasted_iota(jnp.int32, (tq, tk), 0) + qi * tq
        cols = jax.lax.broadcasted_iota(jnp.int32, (tq, tk), 1) + ki * tk
        bias = jnp.where(cols <= rows, jnp.float32(0.0), jnp.float32(-1e30))

        dn = (((1,), (1,)), ((), ()))                          # contract last dims
        for h in range(H):                                     # static unroll
            lo, hi = h * HD, (h + 1) * HD
            # Single lane-dense HD-deep contraction per head (fused q/k).
            sc = jax.lax.dot_general(q[:, lo:hi], k[:, lo:hi], dn,
                                     preferred_element_type=jnp.float32)
            sc = sc + bias

            m_prev = m_s[:, h:h + 1]
            m_new = jnp.maximum(m_prev, jnp.max(sc, axis=-1, keepdims=True))
            alpha = jnp.exp(m_prev - m_new)
            # exp in compute dtype (bf16 on v6e/v7x); running stats stay f32.
            p = jnp.exp((sc - m_new).astype(cdt))
            l_s[:, h:h + 1] = alpha * l_s[:, h:h + 1] + jnp.sum(
                p.astype(jnp.float32), axis=-1, keepdims=True)
            acc_s[:, lo:hi] = alpha * acc_s[:, lo:hi] + jnp.dot(
                p, v[:, lo:hi], preferred_element_type=jnp.float32)
            m_s[:, h:h + 1] = m_new

    @pl.when(ki == pl.num_programs(2) - 1)
    def _finalize():
        inv_l = pl.reciprocal(l_s[...], approx=True)           # (tq, H)
        o_parts = []
        for h in range(H):
            o_parts.append(acc_s[:, h * HD:(h + 1) * HD] * inv_l[:, h:h + 1])
        o_ref[0] = jnp.concatenate(o_parts, axis=-1).astype(o_ref.dtype)


# ---------------------------------------------------------------------------
# Kernel C: output projection, N-tiled weight (streamed, not fully resident).
# ---------------------------------------------------------------------------
def _out_proj_kernel(a_ref, w_ref, o_ref):
    o_ref[0] = jnp.dot(a_ref[0], w_ref[...], preferred_element_type=jnp.float32)


# ---------------------------------------------------------------------------
# Tiling helpers.
# ---------------------------------------------------------------------------
def _seq_tile(n, cap):
    """Largest multiple-of-8 divisor of n that is <= cap (else n itself)."""
    t = min(cap, n)
    t -= t % 8
    while t >= 8:
        if n % t == 0:
            return t
        t -= 8
    # TODO(synk): pad ragged sequence lengths instead of one giant tile.
    return n


def _lane_tile(n, cap=512):
    """Lane-dense (multiple-of-128) divisor of n, else full n."""
    for t in (cap, 256, 128):
        if t <= cap and t % 128 == 0 and n % t == 0:
            return t
    return n


def _vmem_limit_bytes():
    try:
        cap = pltpu.get_tpu_info().vmem_capacity_bytes
    except Exception:
        cap = 128 * 1024 * 1024
    # Leave headroom for internal scratch; cap at 64 MiB on big-VMEM parts.
    return int(min(cap - 16 * 1024 * 1024, 64 * 1024 * 1024))


# ---------------------------------------------------------------------------
# Wrapper.
# ---------------------------------------------------------------------------
def mla_forward(x, params, *, n_heads, max_len=1024, rope_theta=10000.0,
                past_length=0, kv_cache=None, compute_dtype=jnp.bfloat16):
    """MLA forward via Pallas. Returns (output, kv_down) like the PyTorch module."""
    if kv_cache is not None or past_length != 0:
        # TODO(synk): decode path (kv_cache concat / RoPE offset / mask diag).
        raise NotImplementedError("mla_forward only supports the prefill path")

    B, S, D = x.shape
    H = n_heads
    assert D % H == 0, "d_model must be divisible by n_heads"
    HD = D // H
    assert HD % 4 == 0, "head_dim must be a multiple of 4 for RoPE splitting"
    assert (2 * D) % 3 == 0, "kv_proj_dim = 2*d_model/3 must be exact"
    assert S <= max_len
    QPD = D // 2
    KVP = 2 * D // 3
    NR = HD // 2
    R = HD // 2
    Rh = R // 2
    eps = 1e-6
    f32 = jnp.float32
    cdt = compute_dtype

    tS = _seq_tile(S, 256)
    nS = S // tS
    vmem_limit = _vmem_limit_bytes()

    # RoPE half-width tables (prefill: q and k share the same table).
    freqs = 1.0 / (rope_theta ** (jnp.arange(0, HD, 2, dtype=f32) / HD))
    ang = jnp.arange(S, dtype=f32)[:, None] * freqs[None, :Rh]
    cos_h = jnp.cos(ang)                                       # (S, Rh)
    sin_h = jnp.sin(ang)

    # Wrapper-side weight plumbing: bf16 cast, pre-split lane-dense slabs,
    # pre-transposed w_o.  (x is passed in its native dtype: no wrapper cast.)
    scale2d = params["scale"].reshape(1, D).astype(f32)
    w_dq = params["w_dq"].astype(cdt)
    w_uq = params["w_uq"].astype(cdt)
    w_dkv = params["w_dkv"]
    w_dkv_nr = w_dkv[:, :KVP].astype(cdt)
    w_dkv_r = w_dkv[:, KVP:].astype(cdt)
    w_ukv3 = params["w_ukv"].reshape(KVP, H, HD + NR)
    w_uk = w_ukv3[:, :, :NR].reshape(KVP, H * NR).astype(cdt)
    w_uv = w_ukv3[:, :, NR:].reshape(KVP, H * HD).astype(cdt)
    w_o_t = params["w_o"].T.astype(cdt)

    # ---------------- Kernel A: projections ----------------
    # TODO(synk): single-buffer (pipeline_mode) / K-tile the grid-constant
    #             weights for very large d_model so they are not fully resident.
    proj = pl.pallas_call(
        functools.partial(_proj_kernel, eps=eps, H=H, HD=HD, NR=NR, R=R, Rh=Rh,
                          sm_scale=1.0 / math.sqrt(float(HD)), cdt=cdt),
        grid=(B, nS),
        in_specs=[
            pl.BlockSpec((1, tS, D), lambda b, s: (b, s, 0)),        # x (native dtype)
            pl.BlockSpec((1, D), lambda b, s: (0, 0)),               # scale
            pl.BlockSpec((D, QPD), lambda b, s: (0, 0)),             # w_dq
            pl.BlockSpec((QPD, D), lambda b, s: (0, 0)),             # w_uq
            pl.BlockSpec((D, KVP), lambda b, s: (0, 0)),             # w_dkv (no-rope)
            pl.BlockSpec((D, R), lambda b, s: (0, 0)),               # w_dkv (rope)
            pl.BlockSpec((KVP, H * NR), lambda b, s: (0, 0)),        # w_uk
            pl.BlockSpec((KVP, H * HD), lambda b, s: (0, 0)),        # w_uv
            pl.BlockSpec((tS, Rh), lambda b, s: (s, 0)),             # cos
            pl.BlockSpec((tS, Rh), lambda b, s: (s, 0)),             # sin
        ],
        out_specs=[
            pl.BlockSpec((1, tS, D), lambda b, s: (b, s, 0)),        # final_q (flat)
            pl.BlockSpec((1, tS, D), lambda b, s: (b, s, 0)),        # final_k (flat)
            pl.BlockSpec((1, tS, D), lambda b, s: (b, s, 0)),        # value   (flat)
            pl.BlockSpec((1, tS, KVP + R), lambda b, s: (b, s, 0)),  # kv_down cache
        ],
        out_shape=(
            jax.ShapeDtypeStruct((B, S, D), cdt),
            jax.ShapeDtypeStruct((B, S, D), cdt),
            jax.ShapeDtypeStruct((B, S, D), cdt),
            jax.ShapeDtypeStruct((B, S, KVP + R), f32),
        ),
        compiler_params=pltpu.CompilerParams(
            dimension_semantics=("parallel", "parallel"),
            vmem_limit_bytes=vmem_limit),
    )(x, scale2d, w_dq, w_uq, w_dkv_nr, w_dkv_r, w_uk, w_uv, cos_h, sin_h)
    q_final, k_final, v_final, kv_down = proj

    # ---------------- Kernel B: flash attention (flat layout, no transposes) ----
    tq = _seq_tile(S, 256)
    tk = _seq_tile(S, 128)

    def _kv_index(b, qi, ki):
        # Clamp so above-diagonal KV tiles repeat the previous block index and
        # Pallas skips their DMA entirely.
        last_valid = ((qi + 1) * tq - 1) // tk
        return (b, jnp.minimum(ki, last_valid), 0)

    attn = pl.pallas_call(
        functools.partial(_flash_kernel, tq=tq, tk=tk, H=H, HD=HD, cdt=cdt),
        grid=(B, S // tq, S // tk),
        in_specs=[
            pl.BlockSpec((1, tq, D), lambda b, qi, ki: (b, qi, 0)),   # final_q
            pl.BlockSpec((1, tk, D), _kv_index),                      # final_k
            pl.BlockSpec((1, tk, D), _kv_index),                      # value
        ],
        out_specs=pl.BlockSpec((1, tq, D), lambda b, qi, ki: (b, qi, 0)),
        out_shape=jax.ShapeDtypeStruct((B, S, D), cdt),
        scratch_shapes=[
            pltpu.VMEM((tq, H), f32),        # running max (per head)
            pltpu.VMEM((tq, H), f32),        # running denom (per head)
            pltpu.VMEM((tq, D), f32),        # accumulator (all heads, flat)
        ],
        compiler_params=pltpu.CompilerParams(
            dimension_semantics=("parallel", "parallel", "arbitrary"),
            vmem_limit_bytes=vmem_limit),
    )(q_final, k_final, v_final)

    # ---------------- Kernel C: output projection (N-tiled weight) ----------------
    tn = _lane_tile(D, 512)
    out = pl.pallas_call(
        _out_proj_kernel,
        grid=(B, nS, D // tn),
        in_specs=[
            pl.BlockSpec((1, tS, D), lambda b, s, n: (b, s, 0)),
            pl.BlockSpec((D, tn), lambda b, s, n: (0, n)),
        ],
        out_specs=pl.BlockSpec((1, tS, tn), lambda b, s, n: (b, s, n)),
        out_shape=jax.ShapeDtypeStruct((B, S, D), f32),
        compiler_params=pltpu.CompilerParams(
            dimension_semantics=("parallel", "parallel", "parallel"),
            vmem_limit_bytes=vmem_limit),
    )(attn, w_o_t)

    return out, kv_down


# ---------------- pure-JAX reference (mirrors the PyTorch module) ----------------
def mla_reference(x, params, *, n_heads, max_len=1024, rope_theta=10000.0):
    B, S, D = x.shape
    H = n_heads
    HD = D // H
    KVP = 2 * D // 3
    NR = HD // 2
    R = HD // 2
    scale, w_dq, w_uq, w_dkv, w_ukv, w_o = (
        params["scale"], params["w_dq"], params["w_uq"],
        params["w_dkv"], params["w_ukv"], params["w_o"])

    x_norm = x * jax.lax.rsqrt(jnp.mean(x * x, axis=-1, keepdims=True) + 1e-6) * scale
    q = (x_norm @ w_dq) @ w_uq
    q = q.reshape(B, S, H, HD).transpose(0, 2, 1, 3)
    q_no_rope, q_rope = q[..., :NR], q[..., NR:]

    freqs = 1.0 / (rope_theta ** (jnp.arange(0, HD, 2, dtype=jnp.float32) / HD))
    pos = jnp.arange(max_len, dtype=jnp.float32)
    ang = pos[:, None] * freqs[None, :]
    cosc, sinc = jnp.cos(ang), jnp.sin(ang)
    half = R // 2
    cos_q = jnp.tile(cosc[:S, :half], (1, 2))[None, None]
    sin_q = jnp.tile(sinc[:S, :half], (1, 2))[None, None]

    def rot_half(t):
        h = t.shape[-1] // 2
        return jnp.concatenate([-t[..., h:], t[..., :h]], axis=-1)

    q_rope = q_rope * cos_q + rot_half(q_rope) * sin_q

    kv_down = x_norm @ w_dkv
    kv_no_rope, k_rope = kv_down[..., :KVP], kv_down[..., KVP:]
    kv_up = kv_no_rope @ w_ukv
    kv_up = kv_up.reshape(B, S, H, HD + NR).transpose(0, 2, 1, 3)
    key, value = kv_up[..., :NR], kv_up[..., NR:]

    k_rope = k_rope.reshape(B, S, 1, R).transpose(0, 2, 1, 3)
    k_rope = k_rope * cos_q + rot_half(k_rope) * sin_q
    k_rope = jnp.broadcast_to(k_rope, (B, H, S, R))

    final_q = jnp.concatenate([q_no_rope, q_rope], axis=-1)
    final_k = jnp.concatenate([key, k_rope], axis=-1)

    scores = jnp.einsum("bhqd,bhkd->bhqk", final_q, final_k) / math.sqrt(HD)
    mask = jnp.tril(jnp.ones((S, S), dtype=bool))
    scores = jnp.where(mask[None, None], scores, -jnp.inf)
    p = jax.nn.softmax(scores, axis=-1)
    attn = jnp.einsum("bhqk,bhkd->bhqd", p, value)
    attn = attn.transpose(0, 2, 1, 3).reshape(B, S, D)
    return attn @ w_o.T, kv_down


if __name__ == "__main__":
    # small, module-consistent shapes
    B, S = 2, 8
    d_model, n_heads = 48, 4        # head_dim=12, rope_dim=6, kv_proj_dim=32
    QPD = d_model // 2
    KVP = 2 * d_model // 3
    HD = d_model // n_heads
    NR = HD // 2

    key = jax.random.PRNGKey(0)
    k1, k2, k3, k4, k5, k6 = jax.random.split(key, 6)
    params = {
        "scale": jnp.ones((d_model,), jnp.float32),
        "w_dq":  0.01 * jax.random.normal(k1, (d_model, QPD), jnp.float32),
        "w_uq":  0.01 * jax.random.normal(k2, (QPD, d_model), jnp.float32),
        "w_dkv": 0.01 * jax.random.normal(k3, (d_model, KVP + HD // 2), jnp.float32),
        "w_ukv": 0.01 * jax.random.normal(k4, (KVP, d_model + n_heads * NR), jnp.float32),
        "w_o":   0.01 * jax.random.normal(k5, (d_model, d_model), jnp.float32),
    }
    x = jax.random.normal(k6, (B, S, d_model), jnp.float32)

    ref_out, ref_kv = mla_reference(x, params, n_heads=n_heads)

    def max_rel(a, b):
        return float(jnp.max(jnp.abs(a.astype(jnp.float32) - b)) /
                     (jnp.max(jnp.abs(b)) + 1e-30))

    # strict math check (f32 compute path)
    out32, kv32 = mla_forward(x, params, n_heads=n_heads,
                              compute_dtype=jnp.float32)
    out32 = jax.block_until_ready(out32)
    kv32 = jax.block_until_ready(kv32)
    assert max_rel(kv32, ref_kv) < 1e-4, "kv_down mismatch (f32)"
    assert max_rel(out32, ref_out) < 2e-2, "output mismatch (f32)"

    # default bf16 MXU path
    out16, kv16 = mla_forward(x, params, n_heads=n_heads)
    out16 = jax.block_until_ready(out16)
    kv16 = jax.block_until_ready(kv16)
    assert max_rel(kv16, ref_kv) < 2e-2, "kv_down mismatch (bf16)"
    assert max_rel(out16, ref_out) < 6e-2, "output mismatch (bf16)"

    print("KERNEL_OK")
</pallas_src>

<mosaic_0001>
module attributes {stable_mosaic.version = 11 : i64} {
  func.func @_proj_kernel(%arg0: i32, %arg1: i32, %arg2: memref<1x8x48xf32, #tpu.memory_space<vmem>>, %arg3: memref<1x48xf32, #tpu.memory_space<vmem>>, %arg4: memref<48x24xf32, #tpu.memory_space<vmem>>, %arg5: memref<24x48xf32, #tpu.memory_space<vmem>>, %arg6: memref<48x32xf32, #tpu.memory_space<vmem>>, %arg7: memref<48x6xf32, #tpu.memory_space<vmem>>, %arg8: memref<32x24xf32, #tpu.memory_space<vmem>>, %arg9: memref<32x48xf32, #tpu.memory_space<vmem>>, %arg10: memref<8x3xf32, #tpu.memory_space<vmem>>, %arg11: memref<8x3xf32, #tpu.memory_space<vmem>>, %arg12: memref<1x8x48xf32, #tpu.memory_space<vmem>>, %arg13: memref<1x8x48xf32, #tpu.memory_space<vmem>>, %arg14: memref<1x8x48xf32, #tpu.memory_space<vmem>>, %arg15: memref<1x8x38xf32, #tpu.memory_space<vmem>>) attributes {dimension_semantics = [#tpu.dimension_semantics<parallel>, #tpu.dimension_semantics<parallel>], iteration_bounds = array<i64: 2, 1>, scalar_prefetch = 0 : i64, scratch_operands = 0 : i64, tpu.core_type = #tpu.core_type<tc>, window_params = [{transform_indices = @transform_0, window_bounds = array<i64: 1, 8, 48>}, {pipeline_mode = #tpu.pipeline_mode<synchronous>, transform_indices = @transform_1, window_bounds = array<i64: 1, 48>}, {pipeline_mode = #tpu.pipeline_mode<synchronous>, transform_indices = @transform_2, window_bounds = array<i64: 48, 24>}, {pipeline_mode = #tpu.pipeline_mode<synchronous>, transform_indices = @transform_3, window_bounds = array<i64: 24, 48>}, {pipeline_mode = #tpu.pipeline_mode<synchronous>, transform_indices = @transform_4, window_bounds = array<i64: 48, 32>}, {pipeline_mode = #tpu.pipeline_mode<synchronous>, transform_indices = @transform_5, window_bounds = array<i64: 48, 6>}, {pipeline_mode = #tpu.pipeline_mode<synchronous>, transform_indices = @transform_6, window_bounds = array<i64: 32, 24>}, {pipeline_mode = #tpu.pipeline_mode<synchronous>, transform_indices = @transform_7, window_bounds = array<i64: 32, 48>}, {transform_indices = @transform_8, window_bounds = array<i64: 8, 3>}, {transform_indices = @transform_9, window_bounds = array<i64: 8, 3>}, {transform_indices = @transform_10, window_bounds = array<i64: 1, 8, 48>}, {transform_indices = @transform_11, window_bounds = array<i64: 1, 8, 48>}, {transform_indices = @transform_12, window_bounds = array<i64: 1, 8, 48>}, {transform_indices = @transform_13, window_bounds = array<i64: 1, 8, 38>}]} {
    %c0 = arith.constant 0 : index
    %c0_0 = arith.constant 0 : index
    %c0_1 = arith.constant 0 : index
    %0 = vector.load %arg2[%c0, %c0_0, %c0_1] : memref<1x8x48xf32, #tpu.memory_space<vmem>>, vector<1x8x48xf32>
    %1 = vector.shape_cast %0 : vector<1x8x48xf32> to vector<8x48xf32>
    %2 = arith.mulf %1, %1 : vector<8x48xf32>
    %cst = arith.constant dense<0.000000e+00> : vector<8xf32>
    %3 = vector.multi_reduction <add>, %2, %cst [1] : vector<8x48xf32> to vector<8xf32>
    %4 = vector.shape_cast %3 : vector<8xf32> to vector<8x1xf32>
    %cst_2 = arith.constant 4.800000e+01 : f32
    %5 = vector.broadcast %cst_2 : f32 to vector<8x1xf32>
    %6 = arith.divf %4, %5 : vector<8x1xf32>
    %cst_3 = arith.constant 9.99999997E-7 : f32
    %7 = vector.broadcast %cst_3 : f32 to vector<8x1xf32>
    %8 = arith.addf %6, %7 : vector<8x1xf32>
    %9 = math.rsqrt %8 : vector<8x1xf32>
    %10 = vector.broadcast %9 : vector<8x1xf32> to vector<8x48xf32>
    %11 = arith.mulf %1, %10 : vector<8x48xf32>
    %c0_4 = arith.constant 0 : index
    %c0_5 = arith.constant 0 : index
    %12 = vector.load %arg3[%c0_4, %c0_5] : memref<1x48xf32, #tpu.memory_space<vmem>>, vector<1x48xf32>
    %13 = vector.broadcast %12 : vector<1x48xf32> to vector<8x48xf32>
    %14 = arith.mulf %11, %13 : vector<8x48xf32>
    %c0_6 = arith.constant 0 : index
    %c0_7 = arith.constant 0 : index
    %15 = vector.load %arg10[%c0_6, %c0_7] : memref<8x3xf32, #tpu.memory_space<vmem>>, vector<8x3xf32>
    %c0_8 = arith.constant 0 : index
    %c0_9 = arith.constant 0 : index
    %16 = vector.load %arg11[%c0_8, %c0_9] : memref<8x3xf32, #tpu.memory_space<vmem>>, vector<8x3xf32>
    %c0_10 = arith.constant 0 : index
    %c0_11 = arith.constant 0 : index
    %17 = vector.load %arg4[%c0_10, %c0_11] : memref<48x24xf32, #tpu.memory_space<vmem>>, vector<48x24xf32>
    %cst_12 = arith.constant dense<0.000000e+00> : vector<8x24xf32>
    %18 = tpu.matmul %14, %17, %cst_12 {dimension_numbers = #tpu.dot_dimension_numbers<[1], [0], [0], [1], [0, 0, 1, 1], [], []>} : vector<8x48xf32>, vector<48x24xf32>, vector<8x24xf32> -> vector<8x24xf32>
    %c0_13 = arith.constant 0 : index
    %c0_14 = arith.constant 0 : index
    %19 = vector.load %arg5[%c0_13, %c0_14] : memref<24x48xf32, #tpu.memory_space<vmem>>, vector<24x48xf32>
    %cst_15 = arith.constant dense<0.000000e+00> : vector<8x48xf32>
    %20 = tpu.matmul %18, %19, %cst_15 {dimension_numbers = #tpu.dot_dimension_numbers<[1], [0], [0], [1], [0, 0, 1, 1], [], []>} : vector<8x24xf32>, vector<24x48xf32>, vector<8x48xf32> -> vector<8x48xf32>
    %cst_16 = arith.constant 0.288675129 : f32
    %21 = vector.broadcast %cst_16 : f32 to vector<8x48xf32>
    %22 = arith.mulf %20, %21 : vector<8x48xf32>
    %23 = vector.extract_strided_slice %22 {offsets = [0, 0], sizes = [8, 6], strides = [1, 1]} : vector<8x48xf32> to vector<8x6xf32>
    %24 = vector.extract_strided_slice %22 {offsets = [0, 6], sizes = [8, 6], strides = [1, 1]} : vector<8x48xf32> to vector<8x6xf32>
    %25 = vector.extract_strided_slice %24 {offsets = [0, 0], sizes = [8, 3], strides = [1, 1]} : vector<8x6xf32> to vector<8x3xf32>
    %26 = vector.extract_strided_slice %24 {offsets = [0, 3], sizes = [8, 3], strides = [1, 1]} : vector<8x6xf32> to vector<8x3xf32>
    %27 = arith.mulf %25, %15 : vector<8x3xf32>
    %28 = arith.mulf %26, %16 : vector<8x3xf32>
    %29 = arith.subf %27, %28 : vector<8x3xf32>
    %30 = arith.mulf %26, %15 : vector<8x3xf32>
    %31 = arith.mulf %25, %16 : vector<8x3xf32>
    %32 = arith.addf %30, %31 : vector<8x3xf32>
    %33 = tpu.concatenate %29, %32 in 1 : vector<8x3xf32>, vector<8x3xf32> -> vector<8x6xf32>
    %34 = vector.extract_strided_slice %22 {offsets = [0, 12], sizes = [8, 6], strides = [1, 1]} : vector<8x48xf32> to vector<8x6xf32>
    %35 = vector.extract_strided_slice %22 {offsets = [0, 18], sizes = [8, 6], strides = [1, 1]} : vector<8x48xf32> to vector<8x6xf32>
    %36 = vector.extract_strided_slice %35 {offsets = [0, 0], sizes = [8, 3], strides = [1, 1]} : vector<8x6xf32> to vector<8x3xf32>
    %37 = vector.extract_strided_slice %35 {offsets = [0, 3], sizes = [8, 3], strides = [1, 1]} : vector<8x6xf32> to vector<8x3xf32>
    %38 = arith.mulf %36, %15 : vector<8x3xf32>
    %39 = arith.mulf %37, %16 : vector<8x3xf32>
    %40 = arith.subf %38, %39 : vector<8x3xf32>
    %41 = arith.mulf %37, %15 : vector<8x3xf32>
    %42 = arith.mulf %36, %16 : vector<8x3xf32>
    %43 = arith.addf %41, %42 : vector<8x3xf32>
    %44 = tpu.concatenate %40, %43 in 1 : vector<8x3xf32>, vector<8x3xf32> -> vector<8x6xf32>
    %45 = vector.extract_strided_slice %22 {offsets = [0, 24], sizes = [8, 6], strides = [1, 1]} : vector<8x48xf32> to vector<8x6xf32>
    %46 = vector.extract_strided_slice %22 {offsets = [0, 30], sizes = [8, 6], strides = [1, 1]} : vector<8x48xf32> to vector<8x6xf32>
    %47 = vector.extract_strided_slice %46 {offsets = [0, 0], sizes = [8, 3], strides = [1, 1]} : vector<8x6xf32> to vector<8x3xf32>
    %48 = vector.extract_strided_slice %46 {offsets = [0, 3], sizes = [8, 3], strides = [1, 1]} : vector<8x6xf32> to vector<8x3xf32>
    %49 = arith.mulf %47, %15 : vector<8x3xf32>
    %50 = arith.mulf %48, %16 : vector<8x3xf32>
    %51 = arith.subf %49, %50 : vector<8x3xf32>
    %52 = arith.mulf %48, %15 : vector<8x3xf32>
    %53 = arith.mulf %47, %16 : vector<8x3xf32>
    %54 = arith.addf %52, %53 : vector<8x3xf32>
    %55 = tpu.concatenate %51, %54 in 1 : vector<8x3xf32>, vector<8x3xf32> -> vector<8x6xf32>
    %56 = vector.extract_strided_slice %22 {offsets = [0, 36], sizes = [8, 6], strides = [1, 1]} : vector<8x48xf32> to vector<8x6xf32>
    %57 = vector.extract_strided_slice %22 {offsets = [0, 42], sizes = [8, 6], strides = [1, 1]} : vector<8x48xf32> to vector<8x6xf32>
    %58 = vector.extract_strided_slice %57 {offsets = [0, 0], sizes = [8, 3], strides = [1, 1]} : vector<8x6xf32> to vector<8x3xf32>
    %59 = vector.extract_strided_slice %57 {offsets = [0, 3], sizes = [8, 3], strides = [1, 1]} : vector<8x6xf32> to vector<8x3xf32>
    %60 = arith.mulf %58, %15 : vector<8x3xf32>
    %61 = arith.mulf %59, %16 : vector<8x3xf32>
    %62 = arith.subf %60, %61 : vector<8x3xf32>
    %63 = arith.mulf %59, %15 : vector<8x3xf32>
    %64 = arith.mulf %58, %16 : vector<8x3xf32>
    %65 = arith.addf %63, %64 : vector<8x3xf32>
    %66 = tpu.concatenate %62, %65 in 1 : vector<8x3xf32>, vector<8x3xf32> -> vector<8x6xf32>
    %67 = tpu.concatenate %23, %33, %34, %44, %45, %55, %56, %66 in 1 : vector<8x6xf32>, vector<8x6xf32>, vector<8x6xf32>, vector<8x6xf32>, vector<8x6xf32>, vector<8x6xf32>, vector<8x6xf32>, vector<8x6xf32> -> vector<8x48xf32>
    %c0_17 = arith.constant 0 : index
    %c0_18 = arith.constant 0 : index
    %c0_19 = arith.constant 0 : index
    %68 = vector.load %arg12[%c0_17, %c0_18, %c0_19] : memref<1x8x48xf32, #tpu.memory_space<vmem>>, vector<1x8x48xf32>
    %69 = vector.shape_cast %68 : vector<1x8x48xf32> to vector<8x48xf32>
    %70 = vector.shape_cast %67 : vector<8x48xf32> to vector<1x8x48xf32>
    tpu.vector_store %arg12[%c0_17, %c0_18, %c0_19], %70 {strides = array<i32>} : memref<1x8x48xf32, #tpu.memory_space<vmem>>, vector<1x8x48xf32>,
    %c0_20 = arith.constant 0 : index
    %c0_21 = arith.constant 0 : index
    %71 = vector.load %arg6[%c0_20, %c0_21] : memref<48x32xf32, #tpu.memory_space<vmem>>, vector<48x32xf32>
    %cst_22 = arith.constant dense<0.000000e+00> : vector<8x32xf32>
    %72 = tpu.matmul %14, %71, %cst_22 {dimension_numbers = #tpu.dot_dimension_numbers<[1], [0], [0], [1], [0, 0, 1, 1], [], []>} : vector<8x48xf32>, vector<48x32xf32>, vector<8x32xf32> -> vector<8x32xf32>
    %c0_23 = arith.constant 0 : index
    %c0_24 = arith.constant 0 : index
    %73 = vector.load %arg7[%c0_23, %c0_24] : memref<48x6xf32, #tpu.memory_space<vmem>>, vector<48x6xf32>
    %cst_25 = arith.constant dense<0.000000e+00> : vector<8x6xf32>
    %74 = tpu.matmul %14, %73, %cst_25 {dimension_numbers = #tpu.dot_dimension_numbers<[1], [0], [0], [1], [0, 0, 1, 1], [], []>} : vector<8x48xf32>, vector<48x6xf32>, vector<8x6xf32> -> vector<8x6xf32>
    %75 = tpu.concatenate %72, %74 in 1 : vector<8x32xf32>, vector<8x6xf32> -> vector<8x38xf32>
    %c0_26 = arith.constant 0 : index
    %c0_27 = arith.constant 0 : index
    %c0_28 = arith.constant 0 : index
    %76 = vector.load %arg15[%c0_26, %c0_27, %c0_28] : memref<1x8x38xf32, #tpu.memory_space<vmem>>, vector<1x8x38xf32>
    %77 = vector.shape_cast %76 : vector<1x8x38xf32> to vector<8x38xf32>
    %78 = vector.shape_cast %75 : vector<8x38xf32> to vector<1x8x38xf32>
    tpu.vector_store %arg15[%c0_26, %c0_27, %c0_28], %78 {strides = array<i32>} : memref<1x8x38xf32, #tpu.memory_space<vmem>>, vector<1x8x38xf32>,
    %79 = vector.extract_strided_slice %74 {offsets = [0, 0], sizes = [8, 3], strides = [1, 1]} : vector<8x6xf32> to vector<8x3xf32>
    %80 = vector.extract_strided_slice %74 {offsets = [0, 3], sizes = [8, 3], strides = [1, 1]} : vector<8x6xf32> to vector<8x3xf32>
    %81 = arith.mulf %79, %15 : vector<8x3xf32>
    %82 = arith.mulf %80, %16 : vector<8x3xf32>
    %83 = arith.subf %81, %82 : vector<8x3xf32>
    %84 = arith.mulf %80, %15 : vector<8x3xf32>
    %85 = arith.mulf %79, %16 : vector<8x3xf32>
    %86 = arith.addf %84, %85 : vector<8x3xf32>
    %87 = tpu.concatenate %83, %86 in 1 : vector<8x3xf32>, vector<8x3xf32> -> vector<8x6xf32>
    %c0_29 = arith.constant 0 : index
    %c0_30 = arith.constant 0 : index
    %88 = vector.load %arg8[%c0_29, %c0_30] : memref<32x24xf32, #tpu.memory_space<vmem>>, vector<32x24xf32>
    %cst_31 = arith.constant dense<0.000000e+00> : vector<8x24xf32>
    %89 = tpu.matmul %72, %88, %cst_31 {dimension_numbers = #tpu.dot_dimension_numbers<[1], [0], [0], [1], [0, 0, 1, 1], [], []>} : vector<8x32xf32>, vector<32x24xf32>, vector<8x24xf32> -> vector<8x24xf32>
    %90 = vector.extract_strided_slice %89 {offsets = [0, 0], sizes = [8, 6], strides = [1, 1]} : vector<8x24xf32> to vector<8x6xf32>
    %91 = vector.extract_strided_slice %89 {offsets = [0, 6], sizes = [8, 6], strides = [1, 1]} : vector<8x24xf32> to vector<8x6xf32>
    %92 = vector.extract_strided_slice %89 {offsets = [0, 12], sizes = [8, 6], strides = [1, 1]} : vector<8x24xf32> to vector<8x6xf32>
    %93 = vector.extract_strided_slice %89 {offsets = [0, 18], sizes = [8, 6], strides = [1, 1]} : vector<8x24xf32> to vector<8x6xf32>
    %94 = tpu.concatenate %90, %87, %91, %87, %92, %87, %93, %87 in 1 : vector<8x6xf32>, vector<8x6xf32>, vector<8x6xf32>, vector<8x6xf32>, vector<8x6xf32>, vector<8x6xf32>, vector<8x6xf32>, vector<8x6xf32> -> vector<8x48xf32>
    %c0_32 = arith.constant 0 : index
    %c0_33 = arith.constant 0 : index
    %c0_34 = arith.constant 0 : index
    %95 = vector.load %arg13[%c0_32, %c0_33, %c0_34] : memref<1x8x48xf32, #tpu.memory_space<vmem>>, vector<1x8x48xf32>
    %96 = vector.shape_cast %95 : vector<1x8x48xf32> to vector<8x48xf32>
    %97 = vector.shape_cast %94 : vector<8x48xf32> to vector<1x8x48xf32>
    tpu.vector_store %arg13[%c0_32, %c0_33, %c0_34], %97 {strides = array<i32>} : memref<1x8x48xf32, #tpu.memory_space<vmem>>, vector<1x8x48xf32>,
    %c0_35 = arith.constant 0 : index
    %c0_36 = arith.constant 0 : index
    %98 = vector.load %arg9[%c0_35, %c0_36] : memref<32x48xf32, #tpu.memory_space<vmem>>, vector<32x48xf32>
    %cst_37 = arith.constant dense<0.000000e+00> : vector<8x48xf32>
    %99 = tpu.matmul %72, %98, %cst_37 {dimension_numbers = #tpu.dot_dimension_numbers<[1], [0], [0], [1], [0, 0, 1, 1], [], []>} : vector<8x32xf32>, vector<32x48xf32>, vector<8x48xf32> -> vector<8x48xf32>
    %c0_38 = arith.constant 0 : index
    %c0_39 = arith.constant 0 : index
    %c0_40 = arith.constant 0 : index
    %100 = vector.load %arg14[%c0_38, %c0_39, %c0_40] : memref<1x8x48xf32, #tpu.memory_space<vmem>>, vector<1x8x48xf32>
    %101 = vector.shape_cast %100 : vector<1x8x48xf32> to vector<8x48xf32>
    %102 = vector.shape_cast %99 : vector<8x48xf32> to vector<1x8x48xf32>
    tpu.vector_store %arg14[%c0_38, %c0_39, %c0_40], %102 {strides = array<i32>} : memref<1x8x48xf32, #tpu.memory_space<vmem>>, vector<1x8x48xf32>,
    return
  }
  func.func @transform_0(%arg0: i32, %arg1: i32) -> (i32, i32, i32) {
    %c0_i32 = arith.constant 0 : i32
    %c0_i32_0 = arith.constant 0 : i32
    return %arg0, %arg1, %c0_i32 : i32, i32, i32
  }
  func.func @transform_1(%arg0: i32, %arg1: i32) -> (i32, i32) {
    %c0_i32 = arith.constant 0 : i32
    %c0_i32_0 = arith.constant 0 : i32
    %c0_i32_1 = arith.constant 0 : i32
    return %c0_i32, %c0_i32_0 : i32, i32
  }
  func.func @transform_2(%arg0: i32, %arg1: i32) -> (i32, i32) {
    %c0_i32 = arith.constant 0 : i32
    %c0_i32_0 = arith.constant 0 : i32
    %c0_i32_1 = arith.constant 0 : i32
    return %c0_i32, %c0_i32_0 : i32, i32
  }
  func.func @transform_3(%arg0: i32, %arg1: i32) -> (i32, i32) {
    %c0_i32 = arith.constant 0 : i32
    %c0_i32_0 = arith.constant 0 : i32
    %c0_i32_1 = arith.constant 0 : i32
    return %c0_i32, %c0_i32_0 : i32, i32
  }
  func.func @transform_4(%arg0: i32, %arg1: i32) -> (i32, i32) {
    %c0_i32 = arith.constant 0 : i32
    %c0_i32_0 = arith.constant 0 : i32
    %c0_i32_1 = arith.constant 0 : i32
    return %c0_i32, %c0_i32_0 : i32, i32
  }
  func.func @transform_5(%arg0: i32, %arg1: i32) -> (i32, i32) {
    %c0_i32 = arith.constant 0 : i32
    %c0_i32_0 = arith.constant 0 : i32
    %c0_i32_1 = arith.constant 0 : i32
    return %c0_i32, %c0_i32_0 : i32, i32
  }
  func.func @transform_6(%arg0: i32, %arg1: i32) -> (i32, i32) {
    %c0_i32 = arith.constant 0 : i32
    %c0_i32_0 = arith.constant 0 : i32
    %c0_i32_1 = arith.constant 0 : i32
    return %c0_i32, %c0_i32_0 : i32, i32
  }
  func.func @transform_7(%arg0: i32, %arg1: i32) -> (i32, i32) {
    %c0_i32 = arith.constant 0 : i32
    %c0_i32_0 = arith.constant 0 : i32
    %c0_i32_1 = arith.constant 0 : i32
    return %c0_i32, %c0_i32_0 : i32, i32
  }
  func.func @transform_8(%arg0: i32, %arg1: i32) -> (i32, i32) {
    %c0_i32 = arith.constant 0 : i32
    %c0_i32_0 = arith.constant 0 : i32
    return %arg1, %c0_i32 : i32, i32
  }
  func.func @transform_9(%arg0: i32, %arg1: i32) -> (i32, i32) {
    %c0_i32 = arith.constant 0 : i32
    %c0_i32_0 = arith.constant 0 : i32
    return %arg1, %c0_i32 : i32, i32
  }
  func.func @transform_10(%arg0: i32, %arg1: i32) -> (i32, i32, i32) {
    %c0_i32 = arith.constant 0 : i32
    %c0_i32_0 = arith.constant 0 : i32
    return %arg0, %arg1, %c0_i32 : i32, i32, i32
  }
  func.func @transform_11(%arg0: i32, %arg1: i32) -> (i32, i32, i32) {
    %c0_i32 = arith.constant 0 : i32
    %c0_i32_0 = arith.constant 0 : i32
    return %arg0, %arg1, %c0_i32 : i32, i32, i32
  }
  func.func @transform_12(%arg0: i32, %arg1: i32) -> (i32, i32, i32) {
    %c0_i32 = arith.constant 0 : i32
    %c0_i32_0 = arith.constant 0 : i32
    return %arg0, %arg1, %c0_i32 : i32, i32, i32
  }
  func.func @transform_13(%arg0: i32, %arg1: i32) -> (i32, i32, i32) {
    %c0_i32 = arith.constant 0 : i32
    %c0_i32_0 = arith.constant 0 : i32
    return %arg0, %arg1, %c0_i32 : i32, i32, i32
  }
}

</mosaic_0001>

<bundles_post_ra>
// kernel: tpu_custom_call.1
= control target key start
LH: loop header
LB: loop body
LE: loop exit
PB: predicated region body
PF: predicated region fallthrough
CT: control target
= control target key end

     0   :  { %s3330_s0 = inlined_call_operand.hbm [shape: f32[2,8,48], index: 0, kind: input, shape index: {}]   ;;  %s3331_s1 = inlined_call_operand.hbm [shape: f32[1,48], index: 1, kind: input, shape index: {}]   ;;  %s3332_s2 = inlined_call_operand.hbm [shape: f32[48,24], index: 2, kind: input, shape index: {}]   ;;  %s3333_s3 = inlined_call_operand.hbm [shape: f32[24,48], index: 3, kind: input, shape index: {}]   ;;  %s3334_s4 = inlined_call_operand.hbm [shape: f32[48,32], index: 4, kind: input, shape index: {}]   ;;  %s3335_s5 = inlined_call_operand.hbm [shape: f32[48,6], index: 5, kind: input, shape index: {}]   ;;  %s3336_s6 = inlined_call_operand.hbm [shape: f32[32,24], index: 6, kind: input, shape index: {}]   ;;  %s3337_s7 = inlined_call_operand.hbm [shape: f32[32,48], index: 7, kind: input, shape index: {}]   ;;  %s3338_s8 = inlined_call_operand.hbm [shape: f32[8,3], index: 8, kind: input, shape index: {}]   ;;  %s3339_s9 = inlined_call_operand.hbm [shape: f32[8,3], index: 9, kind: input, shape index: {}]   ;;  %s3340_s10 = inlined_call_operand.hbm [shape: f32[2,8,48], index: 10, kind: output, shape index: {0}]   ;;  %s3341_s11 = inlined_call_operand.hbm [shape: f32[2,8,48], index: 11, kind: output, shape index: {1}]   ;;  %s3342_s12 = inlined_call_operand.hbm [shape: f32[2,8,48], index: 12, kind: output, shape index: {2}]   ;;  %s3343_s13 = inlined_call_operand.hbm [shape: f32[2,8,38], index: 13, kind: output, shape index: {3}]  }
   0x1   :  { %3353 = sst [smem:[#allocation36_spill]] %s3330_s0 }
   0x2   :  { %3354 = sst [smem:[#allocation37_spill]] %s3331_s1 }
   0x3   :  { %3355 = sst [smem:[#allocation38_spill]] %s3332_s2 }
   0x4   :  { %3356 = sst [smem:[#allocation39_spill]] %s3333_s3 }
   0x5   :  { %3357 = sst [smem:[#allocation40_spill]] %s3334_s4 }
   0x6   :  { %3358 = sst [smem:[#allocation41_spill]] %s3335_s5 }
   0x7   :  { %3359 = sst [smem:[#allocation42_spill]] %s3336_s6 }
   0x8   :  { %3360 = sst [smem:[#allocation43_spill]] %s3337_s7 }
   0x9   :  { %3361 = sst [smem:[#allocation44_spill]] %s3340_s10 }
   0xa   :  { %3362 = sst [smem:[#allocation45_spill]] %s3341_s11 }
   0xb   :  { %3363 = sst [smem:[#allocation46_spill]] %s3342_s12 }
   0xc   :  { %3364 = sst [smem:[#allocation47_spill]] %s3343_s13 }
   0xd   :  { %19 = vsyncpa [#allocation3], 0 }
   0xe   :  { %21 = vsyncpa [#allocation3 + $0x1], 0 }
   0xf   :  { %22 = vsyncpa [#allocation6], 0 }
  0x10   :  { %23 = vsyncpa [#allocation9], 0 }
  0x11   :  { %24 = vsyncpa [#allocation12], 0 }
  0x12   :  { %25 = vsyncpa [#allocation15], 0 }
  0x13   :  { %26 = vsyncpa [#allocation18], 0 }
  0x14   :  { %27 = vsyncpa [#allocation4], 0 }
  0x15   :  { %29 = vsyncpa [#allocation4 + $0x1], 0 }
  0x16   :  { %30 = vsyncpa [#allocation21], 0 }
  0x17   :  { %32 = vsyncpa [#allocation21 + $0x1], 0 }
  0x18   :  { %33 = vsyncpa [#allocation24], 0 }
  0x19   :  { %35 = vsyncpa [#allocation24 + $0x1], 0  ;;  %s2673_s25 = smov 0   ;;  %s2675_s26 = smov 0  }
  0x1a   :  { %s2677_s27 = smov 0   ;;  %s2679_s28 = smov 0  }
  0x1b   :  { %s2681_s29 = smov 0   ;;  %s2683_s30 = smov 0  }
  0x1c LB: > { %3365 = sst [smem:[#allocation34_spill]] %s2558_s28  ;;  %s2704_s14 = sadd.s32 4294967295, %s2566_s30   ;;  %s2566_s30 = sphi %s2683_s30, %s41_s30   ;;  %s2562_s29 = sphi %s2681_s29, %s3410_s29   ;;  %s2558_s28 = sphi %s2679_s28, %s3409_s28   ;;  %s2554_s27 = sphi %s2677_s27, %s3408_s27   ;;  %s2550_s26 = sphi %s2675_s26, %s3407_s26   ;;  %s2546_s25 = sphi %s2673_s25, %s3406_s25  }
  0x1d   : > { %p1701_p0 = scmp.ge.s32.totalorder %s2566_s30, 1  ;;  %p3347_p1 = scmp.eq.s32.totalorder %s2704_s14, 0 }
  0x1e   : > { %p397_p2 = scmp.lt.s32.totalorder %s2566_s30, 3  ;;  %s2568_s16 = smov [#allocation5]  }
  0x1f   : > { %s410_s17 = sshll.u32 %s2568_s16, 4  ;;  %s2569_s19 = smov [#allocation8]   ;;  %s411_s17 = int_to_ptr.vmem [resolvable:$true] %s410_s17 }
  0x20   : > { %p2709_p3 = pnand %p1701_p0, %p397_p2  ;;  %s433_s20 = sshll.u32 %s2569_s19, 4  ;;  %s2722_s20 = int_to_ptr.vmem [resolvable:$true] %s433_s20 }
  0x21   : > { %s2570_s21 = smov [#allocation11]   ;;  %s3369_s1 = sld [smem:[#allocation37_spill]] }
  0x22   : > { %s3366_s15 = scalar_select %p2709_p3, 1, 0 }
  0x23   : > { %p1945_p5 = pneg %p2709_p3  ;;  %s2724_s22 = sshll.u32 %s2570_s21, 4  ;;  %s460_s22 = int_to_ptr.vmem [resolvable:$true] %s2724_s22 }
  0x24   : > { %3367 = sst [smem:[#allocation35_spill]] %s3366_s15 }
  0x25   : > { %p2718_p6 = pnand %p1945_p5, %p3347_p1 }
  0x27   : > { %s2090_s16 = scalar_lea.hbm %s3369_s1, 16  ;;  %p2734_p8 = pneg %p2718_p6 }
  0x28   : > { %p2091_p7 = scmp.ne.s32.totalorder %s3369_s1, %s2090_s16  ;;  %p2097_p11 = scmp.lt.u32.totalorder %s2090_s16, %s3369_s1 }
  0x2a   : > { %p2093_p9 = pnand %p2734_p8, %p2091_p7 }
  0x2c   : > { %p2094_p10 = pneg %p2093_p9 }
  0x2e   : > { %p2099_p12 = pnand %p2097_p11, %p2094_p10 }
  0x30   : > { %2102 = shalt.err (!%p2099_p12)
}
  0x31   : > { %s2103_s23 = scalar_lea.vmem %s411_s17, 16  ;;  %s2110_s10 = scalar_lea.vmem %s411_s17, 32 }
  0x32   : > { %p2104_p13 = scmp.ne.s32.totalorder %s411_s17, %s2103_s23  ;;  %p2111_p5 = scmp.lt.s32.totalorder %s411_s17, %s411_s17 }
  0x33   : > { %p2112_p4 = scmp.lt.s32.totalorder %s2110_s10, %s2103_s23 }
  0x34   : > { %p2106_p0 = pnand %p2104_p13, %p2734_p8 }
  0x35   : > { %p2113_p1 = por %p2112_p4, %p2111_p5 }
  0x36   : > { %p2107_p2 = pneg %p2106_p0 }
  0x38   : > { %p2114_p3 = pnand %p2113_p1, %p2107_p2 }
  0x3a   : > { %2117 = shalt.err (!%p2114_p3)
}
  0x3b   : > { %1948 = dma.hbm_to_vmem [thread:$0]  (!%p2718_p6), %s3369_s1, 16, %s411_s17, [#allocation6]  }
  0x3c   : > { %s3371_s3 = sld [smem:[#allocation39_spill]] }
  0x42   : > { %s2118_s21 = scalar_lea.hbm %s3371_s3, 384 }
  0x43   : > { %p2119_p7 = scmp.ne.s32.totalorder %s3371_s3, %s2118_s21  ;;  %p2125_p1 = scmp.lt.u32.totalorder %s2118_s21, %s3371_s3 }
  0x45   : > { %p2121_p9 = pnand %p2119_p7, %p2734_p8 }
  0x47   : > { %p2122_p4 = pneg %p2121_p9 }
  0x49   : > { %p2127_p3 = pnand %p2125_p1, %p2122_p4 }
  0x4b   : > { %2130 = shalt.err (!%p2127_p3)
}
  0x4c   : > { %s2131_s17 = scalar_lea.vmem %s2722_s20, 384  ;;  %p2139_p13 = scmp.lt.s32.totalorder %s2722_s20, %s2722_s20 }
  0x4d   : > { %p2132_p10 = scmp.ne.s32.totalorder %s2722_s20, %s2131_s17  ;;  %p2140_p0 = scmp.lt.s32.totalorder %s2131_s17, %s2131_s17 }
  0x4f   : > { %p2134_p11 = pnand %p2132_p10, %p2734_p8  ;;  %p2141_p2 = por %p2140_p0, %p2139_p13 }
  0x51   : > { %p2135_p12 = pneg %p2134_p11 }
  0x53   : > { %p2142_p5 = pnand %p2141_p2, %p2135_p12 }
  0x55   : > { %2145 = shalt.err (!%p2142_p5)
}
  0x56   : > { %s2571_s11 = smov 128   ;;  %s2572_s28 = smov 8  }
  0x57   : > { %1954 = dma.hbm_to_vmem [thread:$0]  (!%p2718_p6), %s3371_s3, 384, %s2722_s20, [#allocation9], %s2571_s11, %s2571_s11, %s2572_s28  }
  0x58   : > { %s3372_s5 = sld [smem:[#allocation41_spill]] }
  0x5e   : > { %s2146_s21 = scalar_lea.hbm %s3372_s5, 768 }
  0x5f   : > { %p2147_p7 = scmp.ne.s32.totalorder %s3372_s5, %s2146_s21  ;;  %p2153_p1 = scmp.lt.u32.totalorder %s2146_s21, %s3372_s5 }
  0x61   : > { %p2149_p9 = pnand %p2147_p7, %p2734_p8 }
  0x63   : > { %p2150_p4 = pneg %p2149_p9 }
  0x65   : > { %p2155_p3 = pnand %p2153_p1, %p2150_p4 }
  0x67   : > { %2158 = shalt.err (!%p2155_p3)
}
  0x68   : > { %s2159_s13 = scalar_lea.vmem %s460_s22, 768  ;;  %p2167_p13 = scmp.lt.s32.totalorder %s460_s22, %s460_s22 }
  0x69   : > { %p2160_p10 = scmp.ne.s32.totalorder %s460_s22, %s2159_s13  ;;  %p2168_p0 = scmp.lt.s32.totalorder %s2159_s13, %s2159_s13 }
  0x6b   : > { %p2162_p11 = pnand %p2160_p10, %p2734_p8  ;;  %p2169_p2 = por %p2168_p0, %p2167_p13 }
  0x6d   : > { %p2163_p12 = pneg %p2162_p11 }
  0x6f   : > { %p2170_p5 = pnand %p2169_p2, %p2163_p12 }
  0x71   : > { %2173 = shalt.err (!%p2170_p5)
}
  0x72   : > { %1960 = dma.hbm_to_vmem [thread:$0]  (!%p2718_p6), %s3372_s5, 768, %s460_s22, [#allocation12], %s2571_s11, %s2571_s11, %s2572_s28  }
  0x73   : > { %s2573_s24 = smov [#allocation14]   ;;  %s2574_s19 = smov [#allocation7]  }
  0x74   : > { %s485_s16 = sshll.u32 %s2573_s24, 4  ;;  %s420_s21 = sshll.u32 %s2574_s19, 4  ;;  %s486_s16 = int_to_ptr.vmem [resolvable:$true] %s485_s16  ;;  %s421_s21 = int_to_ptr.vmem [resolvable:$true] %s420_s21 }
  0x75   : > { %s3373_s7 = sld [smem:[#allocation43_spill]] }
  0x7b   : > { %s2174_s17 = scalar_lea.hbm %s3373_s7, 512 }
  0x7c   : > { %p2175_p7 = scmp.ne.s32.totalorder %s3373_s7, %s2174_s17  ;;  %p2181_p1 = scmp.lt.u32.totalorder %s2174_s17, %s3373_s7 }
  0x7e   : > { %p2177_p9 = pnand %p2175_p7, %p2734_p8 }
  0x80   : > { %p2178_p4 = pneg %p2177_p9 }
  0x82   : > { %p2183_p3 = pnand %p2181_p1, %p2178_p4 }
  0x84   : > { %2186 = shalt.err (!%p2183_p3)
}
  0x85   : > { %s2187_s22 = scalar_lea.vmem %s486_s16, 512  ;;  %p2195_p13 = scmp.lt.s32.totalorder %s486_s16, %s486_s16 }
  0x86   : > { %p2188_p10 = scmp.ne.s32.totalorder %s486_s16, %s2187_s22  ;;  %p2196_p0 = scmp.lt.s32.totalorder %s2187_s22, %s2187_s22 }
  0x88   : > { %p2190_p11 = pnand %p2188_p10, %p2734_p8  ;;  %p2197_p2 = por %p2196_p0, %p2195_p13 }
  0x8a   : > { %p2191_p12 = pneg %p2190_p11 }
  0x8c   : > { %p2198_p5 = pnand %p2197_p2, %p2191_p12 }
  0x8e   : > { %2201 = shalt.err (!%p2198_p5)
}
  0x8f   : > { %1966 = dma.hbm_to_vmem [thread:$0]  (!%p2718_p6), %s3373_s7, 512, %s486_s16, [#allocation15], %s2571_s11, %s2571_s11, %s2572_s28  }
  0x90   : > { %s3374_s2 = sld [smem:[#allocation38_spill]] }
  0x96   : > { %s2202_s19 = scalar_lea.hbm %s3374_s2, 768 }
  0x97   : > { %p2203_p7 = scmp.ne.s32.totalorder %s3374_s2, %s2202_s19  ;;  %p2209_p1 = scmp.lt.u32.totalorder %s2202_s19, %s3374_s2 }
  0x99   : > { %p2205_p9 = pnand %p2203_p7, %p2734_p8 }
  0x9b   : > { %p2206_p4 = pneg %p2205_p9 }
  0x9d   : > { %p2211_p3 = pnand %p2209_p1, %p2206_p4 }
  0x9f   : > { %2214 = shalt.err (!%p2211_p3)
}
  0xa0   : > { %s2215_s1 = scalar_lea.vmem %s421_s21, 768  ;;  %p2223_p13 = scmp.lt.s32.totalorder %s421_s21, %s421_s21 }
  0xa1   : > { %p2216_p10 = scmp.ne.s32.totalorder %s421_s21, %s2215_s1  ;;  %p2224_p0 = scmp.lt.s32.totalorder %s2215_s1, %s2215_s1 }
  0xa3   : > { %p2218_p11 = pnand %p2216_p10, %p2734_p8  ;;  %p2225_p2 = por %p2224_p0, %p2223_p13 }
  0xa5   : > { %p2219_p12 = pneg %p2218_p11 }
  0xa7   : > { %p2226_p5 = pnand %p2225_p2, %p2219_p12 }
  0xa9   : > { %2229 = shalt.err (!%p2226_p5)
}
  0xaa   : > { %1951 = dma.hbm_to_vmem [thread:$0]  (!%p2718_p6), %s3374_s2, 768, %s421_s21, [#allocation6], %s2571_s11, %s2571_s11, %s2572_s28  }
  0xab   : > { %s2575_s3 = smov [#allocation10]   ;;  %s2576_s20 = smov [#allocation13]  }
  0xac   : > { %s446_s15 = sshll.u32 %s2575_s3, 4  ;;  %s472_s24 = sshll.u32 %s2576_s20, 4  ;;  %s447_s15 = int_to_ptr.vmem [resolvable:$true] %s446_s15  ;;  %s473_s24 = int_to_ptr.vmem [resolvable:$true] %s472_s24 }
  0xad   : > { %s3375_s4 = sld [smem:[#allocation40_spill]] }
  0xb3   : > { %s2230_s10 = scalar_lea.hbm %s3375_s4, 768 }
  0xb4   : > { %p2231_p7 = scmp.ne.s32.totalorder %s3375_s4, %s2230_s10  ;;  %p2237_p1 = scmp.lt.u32.totalorder %s2230_s10, %s3375_s4 }
  0xb6   : > { %p2233_p9 = pnand %p2231_p7, %p2734_p8 }
  0xb8   : > { %p2234_p4 = pneg %p2233_p9 }
  0xba   : > { %p2239_p3 = pnand %p2237_p1, %p2234_p4 }
  0xbc   : > { %2242 = shalt.err (!%p2239_p3)
}
  0xbd   : > { %s2243_s21 = scalar_lea.vmem %s447_s15, 768  ;;  %p2251_p13 = scmp.lt.s32.totalorder %s447_s15, %s447_s15 }
  0xbe   : > { %p2244_p10 = scmp.ne.s32.totalorder %s447_s15, %s2243_s21  ;;  %p2252_p0 = scmp.lt.s32.totalorder %s2243_s21, %s2243_s21 }
  0xc0   : > { %p2246_p11 = pnand %p2244_p10, %p2734_p8  ;;  %p2253_p2 = por %p2252_p0, %p2251_p13 }
  0xc2   : > { %p2247_p12 = pneg %p2246_p11 }
  0xc4   : > { %p2254_p5 = pnand %p2253_p2, %p2247_p12 }
  0xc6   : > { %2257 = shalt.err (!%p2254_p5)
}
  0xc7   : > { %1957 = dma.hbm_to_vmem [thread:$0]  (!%p2718_p6), %s3375_s4, 768, %s447_s15, [#allocation9], %s2571_s11, %s2571_s11, %s2572_s28  }
  0xc8   : > { %s3376_s6 = sld [smem:[#allocation42_spill]] }
  0xce   : > { %s2258_s23 = scalar_lea.hbm %s3376_s6, 512 }
  0xcf   : > { %p2259_p7 = scmp.ne.s32.totalorder %s3376_s6, %s2258_s23  ;;  %p2265_p1 = scmp.lt.u32.totalorder %s2258_s23, %s3376_s6 }
  0xd1   : > { %p2261_p9 = pnand %p2259_p7, %p2734_p8 }
  0xd3   : > { %p2262_p4 = pneg %p2261_p9 }
  0xd5   : > { %p2267_p3 = pnand %p2265_p1, %p2262_p4 }
  0xd7   : > { %2270 = shalt.err (!%p2267_p3)
}
  0xd8   : > { %s2271_s16 = scalar_lea.vmem %s473_s24, 512  ;;  %p2279_p13 = scmp.lt.s32.totalorder %s473_s24, %s473_s24 }
  0xd9   : > { %p2272_p10 = scmp.ne.s32.totalorder %s473_s24, %s2271_s16  ;;  %p2280_p0 = scmp.lt.s32.totalorder %s2271_s16, %s2271_s16 }
  0xdb   : > { %p2274_p11 = pnand %p2272_p10, %p2734_p8  ;;  %p2281_p2 = por %p2280_p0, %p2279_p13 }
  0xdd   : > { %p2275_p12 = pneg %p2274_p11 }
  0xdf   : > { %p2282_p5 = pnand %p2281_p2, %p2275_p12 }
  0xe1   : > { %2285 = shalt.err (!%p2282_p5)
}
  0xe2   : > { %1963 = dma.hbm_to_vmem [thread:$0]  (!%p2718_p6), %s3376_s6, 512, %s473_s24, [#allocation12], %s2571_s11, %s2571_s11, %s2572_s28  }
  0xe3   : > { %s2577_s22 = smov [#allocation16]   ;;  %s2578_s20 = smov [#allocation17]  }
  0xe4   : > { %s501_s3 = sshll.u32 %s2577_s22, 4  ;;  %s514_s19 = sshll.u32 %s2578_s20, 4  ;;  %s502_s3 = int_to_ptr.vmem [resolvable:$true] %s501_s3  ;;  %s515_s19 = int_to_ptr.vmem [resolvable:$true] %s514_s19 }
  0xe5   : > { %s2286_s17 = scalar_lea.hbm %s3338_s8, 128 }
  0xe6   : > { %p2287_p7 = scmp.ne.s32.totalorder %s3338_s8, %s2286_s17  ;;  %p2293_p1 = scmp.lt.u32.totalorder %s2286_s17, %s3338_s8 }
  0xe8   : > { %p2289_p9 = pnand %p2287_p7, %p2734_p8 }
  0xea   : > { %p2290_p4 = pneg %p2289_p9 }
  0xec   : > { %p2295_p3 = pnand %p2293_p1, %p2290_p4 }
  0xee   : > { %2298 = shalt.err (!%p2295_p3)
}
  0xef   : > { %s2299_s11 = scalar_lea.vmem %s502_s3, 128  ;;  %p2307_p13 = scmp.lt.s32.totalorder %s502_s3, %s502_s3 }
  0xf0   : > { %p2300_p10 = scmp.ne.s32.totalorder %s502_s3, %s2299_s11  ;;  %p2308_p0 = scmp.lt.s32.totalorder %s2299_s11, %s2299_s11 }
  0xf2   : > { %p2302_p11 = pnand %p2300_p10, %p2734_p8  ;;  %p2309_p2 = por %p2308_p0, %p2307_p13 }
  0xf4   : > { %p2303_p12 = pneg %p2302_p11 }
  0xf6   : > { %p2310_p5 = pnand %p2309_p2, %p2303_p12 }
  0xf8   : > { %2313 = shalt.err (!%p2310_p5)
}
  0xf9   : > { %1969 = dma.hbm_to_vmem [thread:$0]  (!%p2718_p6), %s3338_s8, 128, %s502_s3, [#allocation15]  }
  0xfa   : > { %s2314_s20 = scalar_lea.hbm %s3339_s9, 128 }
  0xfb   : > { %p2315_p7 = scmp.ne.s32.totalorder %s3339_s9, %s2314_s20  ;;  %p2321_p1 = scmp.lt.u32.totalorder %s2314_s20, %s3339_s9 }
  0xfd   : > { %p2317_p9 = pnand %p2315_p7, %p2734_p8 }
  0xff   : > { %p2318_p4 = pneg %p2317_p9 }
 0x101   : > { %p2323_p3 = pnand %p2321_p1, %p2318_p4 }
 0x103   : > { %2326 = shalt.err (!%p2323_p3)
}
 0x104   : > { %s2327_s1 = scalar_lea.vmem %s515_s19, 128  ;;  %p2335_p13 = scmp.lt.s32.totalorder %s515_s19, %s515_s19 }
 0x105   : > { %p2328_p10 = scmp.ne.s32.totalorder %s515_s19, %s2327_s1  ;;  %p2336_p0 = scmp.lt.s32.totalorder %s2327_s1, %s2327_s1 }
 0x107   : > { %p2330_p11 = pnand %p2328_p10, %p2734_p8  ;;  %p2337_p2 = por %p2336_p0, %p2335_p13 }
 0x109   : > { %p2331_p12 = pneg %p2330_p11 }
 0x10b   : > { %p2338_p5 = pnand %p2337_p2, %p2331_p12 }
 0x10d   : > { %2341 = shalt.err (!%p2338_p5)
}
 0x10e   : > { %1972 = dma.hbm_to_vmem [thread:$0]  (!%p2718_p6), %s3339_s9, 128, %s515_s19, [#allocation18]  }
 0x10f   : > { %s3351_s12 = sadd.s32 4294967294, %s2566_s30   ;;  %s53_s18 = sadd.s32 1, %s2562_s29 }
 0x110   : > { %s62_s15 = sadd.s32 1, %s2554_s27  ;;  %p55_p8 = scmp.ge.s32.totalorder %s53_s18, 2 }
 0x111   : > { %p69_p7 = scmp.ne.s32.totalorder %s2554_s27, %s2550_s26  ;;  %p70_p9 = scmp.eq.s32.totalorder %s2566_s30, 0 }
 0x112   : > { %p75_p4 = scmp.ne.s32.totalorder %s2550_s26, %s2546_s25  ;;  %s3412_s18 = smov (%p55_p8, %s53_s18), 0 }
 0x113   : > { %p2928_p1 = por %p70_p9, %p69_p7  ;;  %p3378_p3 = scmp.eq.s32.totalorder %s2704_s14, 0 }
 0x114   : > { %s57_s28 = ssub.s32 %s2562_s29, %s3412_s18  ;;  %p300_p10 = scmp.eq.s32.totalorder %s2704_s14, 1 }
 0x115   : > { %p2934_p6 = por %p3378_p3, %p75_p4  ;;  %p60_p11 = scmp.eq.s32.totalorder %s57_s28, 0 }
 0x116   : > { %p306_p12 = scmp.eq.s32.totalorder %s3351_s12, 1  ;;  %p2943_p13 = por %p300_p10, %p69_p7 }
 0x117   : > { %p1999_p0 = scmp.lt.s32.totalorder %s2566_s30, 2  ;;  %s525_s20 = sand.u32 1, %s2554_s27  }
 0x118   : > { %s3380_s24 = scalar_select %p2943_p13, 1, 0 }
 0x119   : > { %s2949_s21 = scalar_select %p60_p11, %s2554_s27, %s62_s15  }
 0x11a   : > { %p2951_p2 = por %p306_p12, %p75_p4  ;;  %s1712_s23 = sshll.u32 %s525_s20, 3 }
 0x11b   : > { %s1713_s10 = sshll.u32 %s2562_s29, 7  ;;  %s3382_s0 = sld [smem:[#allocation36_spill]] }
 0x11c   : > { %s3381_s22 = scalar_select %p2951_p2, 1, 0 }
 0x11d   : > { %s529_s3 = scalar_lea.vmem [#allocation2], %s1712_s23  ;;  %p2966_p5 = pnand %p1999_p0, %p2928_p1 }
 0x11e   : > { %s537_s16 = sshll.u32 %s529_s3, 4  ;;  %s526_s28 = scalar_lea.sflag [#allocation3], %s525_s20  ;;  %s2962_s16 = int_to_ptr.vmem [resolvable:$true] %s537_s16 }
 0x11f   : > { %p2344_p7 = pneg %p2966_p5 }
 0x121   : > { %s2960_s1 = scalar_lea.hbm %s3382_s0, %s1713_s10  ;;  %s2347_s17 = scalar_lea.hbm %s3382_s0, 256 }
 0x122   : > { %s2342_s12 = scalar_lea.hbm %s2960_s1, 128  ;;  %p2348_p1 = scmp.lt.u32.totalorder %s2960_s1, %s3382_s0 }
 0x123   : > { %p2343_p8 = scmp.ne.s32.totalorder %s2960_s1, %s2342_s12  ;;  %p2349_p3 = scmp.lt.u32.totalorder %s2347_s17, %s2342_s12 }
 0x124   : > { %p2351_p11 = scmp.lt.u32.totalorder %s2342_s12, %s2960_s1 }
 0x125   : > { %p2345_p9 = pnand %p2344_p7, %p2343_p8  ;;  %p2350_p10 = por %p2349_p3, %p2348_p1 }
 0x127   : > { %p2346_p4 = pneg %p2345_p9  ;;  %p2352_p12 = por %p2351_p11, %p2350_p10 }
 0x129   : > { %p2353_p0 = pnand %p2352_p12, %p2346_p4 }
 0x12b   : > { %2356 = shalt.err (!%p2353_p0)
}
 0x12c   : > { %s2357_s20 = scalar_lea.vmem %s2962_s16, 128  ;;  %s2579_s3 = smov [#allocation2]  }
 0x12d   : > { %p2358_p8 = scmp.ne.s32.totalorder %s2962_s16, %s2357_s20  ;;  %s2362_s23 = sshll.u32 %s2579_s3, 4  ;;  %s2363_s23 = int_to_ptr.vmem [resolvable:$false] %s2362_s23 }
 0x12e   : > { %s2364_s10 = scalar_lea.vmem %s2363_s23, 256  ;;  %p2365_p13 = scmp.lt.s32.totalorder %s2962_s16, %s2363_s23 }
 0x12f   : > { %p2360_p9 = pnand %p2358_p8, %p2344_p7  ;;  %p2366_p1 = scmp.lt.s32.totalorder %s2364_s10, %s2357_s20 }
 0x131   : > { %p2361_p2 = pneg %p2360_p9  ;;  %p2367_p3 = por %p2366_p1, %p2365_p13 }
 0x133   : > { %p2368_p10 = pnand %p2367_p3, %p2361_p2 }
 0x135   : > { %2371 = shalt.err (!%p2368_p10)
}
 0x136   : > { %1976 = dma.hbm_to_vmem [thread:$0]  (!%p2966_p5), %s2960_s1, 128, %s2962_s16, %s526_s28  }
 0x137   : > { %s3384_s12 = sld [smem:[#allocation35_spill]] }
 0x13d   : > { %p3385_p4 = scmp.ne.s32.totalorder %s3384_s12, 0 }
 0x13e   : > { %s2998_s17 = sand.u32 (!%p3385_p4), 1, %s2550_s26  }
 0x13f   : > { %546 = sbr.rel (%p3385_p4) target bundleno = 1363 (0x553), region = 60  ;;  %s3001_s11 = sshll.u32 (!%p3385_p4), %s2998_s17, 3 }
 0x140   : > { %s549_s13 = scalar_lea.sflag (!%p3385_p4), [#allocation3], %s2998_s17  ;;  %s552_s20 = scalar_lea.vmem (!%p3385_p4), [#allocation2], %s3001_s11 }
 0x146   : > { %2509 = dma.done.wait (%p2934_p6), %s549_s13, 128  }
 0x147   : > { %2511 = vsyncadd (%p2934_p6), %s549_s13, 4294967168  ;;  %p3386_p13 = scmp.eq.s32.totalorder %s2704_s14, 0 }
 0x149   : > { %2513 = dma.done.wait (%p3386_p13), [#allocation6], 784   ;;  %p3387_p2 = pmov %p3386_p13 }
 0x14b   : > { %2515 = vsyncadd (%p3387_p2), [#allocation6], 4294966512  ;;  %p3388_p5 = pmov %p3387_p2 }
 0x14c   : > { %p3389_p7 = pmov %p3387_p2 }
 0x14d   : > { %2517 = dma.done.wait (%p3388_p5), [#allocation9], 1152  }
 0x14e   : > { %2519 = vsyncadd (%p3389_p7), [#allocation9], 4294966144  ;;  %p3390_p11 = pmov %p3387_p2 }
 0x14f   : > { %p3391_p12 = pmov %p3387_p2 }
 0x150   : > { %2521 = dma.done.wait (%p3390_p11), [#allocation12], 1280  }
 0x151   : > { %2523 = vsyncadd (%p3391_p12), [#allocation12], 4294966016  ;;  %p3392_p6 = pmov %p3387_p2 }
 0x152   : > { %p3393_p0 = pmov %p3387_p2 }
 0x153   : > { %2525 = dma.done.wait (%p3392_p6), [#allocation15], 640  }
 0x154   : > { %2527 = vsyncadd (%p3393_p0), [#allocation15], 4294966656  ;;  %p3394_p8 = pmov %p3393_p0 }
 0x155   : > { %p3395_p9 = pmov %p3393_p0 }
 0x156   : > { %2529 = dma.done.wait (%p3394_p8), [#allocation18], 128  }
 0x157   : > { %2531 = vsyncadd (%p3395_p9), [#allocation18], 4294967168  ;;  %v646_v0 = vld [vmem:[%s552_s20] sm:$0xff]  ;;  %vm648_vm0 = vcmask 392192   ;;  %v667_v3 = vld [vmem:[#allocation7] sm:$0xff]  ;;  %v2580_v6 = vmov 0.0|0.0  }
 0x158   : > { %v647_v1 = vmul.f32 %v646_v0, %v646_v0  ;;  %v668_v4 = vld [vmem:[#allocation7 + $0x8] sm:$0xff]  ;;  %v669_v5 = vld [vmem:[#allocation7 + $0x10] sm:$0xff]  ;;  %1857 = vmatprep.subr.bf16.mxu0 %v2580_v6  ;;  %v670_v8 = vld [vmem:[#allocation7 + $0x18] sm:$0xff]  ;;  %vm2581_vm1 = vmmov 0   ;;  %v2582_v9 = vmov 0.0   ;;  %1866 = vmatprep.subr.bf16.mxu1 %v2580_v6  ;;  %s2583_s19 = smov 9  }
 0x159   : > { %v1858_v7 = vpack.c.bf16 %v668_v4, %v667_v3  ;;  %1793 = vmatprep.mubr.msk.f32.mxu0 %vm2581_vm1, %v2582_v9  ;;  %1802 = vmatprep.mubr.msk.f32.mxu1 %vm2581_vm1, %v2582_v9  ;;  %v1861_v10 = vpack.c.bf16 %v670_v8, %v669_v5  ;;  %v671_v11 = vld [vmem:[#allocation7 + $0x20] sm:$0xff]  ;;  %v672_v12 = vld [vmem:[#allocation7 + $0x28] sm:$0xff]  ;;  %v3039_v14 = vld [vmem:[#allocation17] sm:$0xff]  ;;  %s2584_s1 = smov 3   ;;  %s2585_s16 = smov 6   ;;  %vm749_vm2 = vcmask 195584  }
 0x15a   : > { %v649_v2 = vsel %vm648_vm0, %v647_v1, 0.0  ;;  %v1864_v13 = vpack.c.bf16 %v672_v12, %v671_v11  ;;  %v746_v15 = vld [vmem:[#allocation8] sm:$0xff]  ;;  %v747_v16 = vld [vmem:[#allocation8 + $0x8] sm:$0xff]  ;;  %v748_v18 = vld [vmem:[#allocation8 + $0x10] sm:$0xff]  ;;  %843 = vrot.lane.b32.xlu1 %v3039_v14, %s2585_s16  ;;  %s2586_s15 = smov 21   ;;  %s2587_s28 = smov 33  }
 0x15b   : > { %650 = vadd.xlane.f32.xlu0 %v649_v2  ;;  %1859 = vmatpush3.bf16.msra.mxu0 %v1858_v7  ;;  %v1867_v17 = vpack.c.bf16 %v747_v16, %v746_v15  ;;  %v1073_v22 = vld [vmem:[#allocation11] sm:$0xff]  ;;  %v1074_v23 = vld [vmem:[#allocation11 + $0x8] sm:$0xff]  ;;  %v1075_v29 = vld [vmem:[#allocation11 + $0x10] sm:$0xff]  ;;  %s2588_s3 = smov 18   ;;  %s2589_s23 = smov 45   ;;  %vm1153_vm3 = vcmask 261120  }
 0x15c   : > { %1860 = vmatprep.subr.bf16.mxu0 %v2580_v6  ;;  %v1729_v25 = vld [vmem:[#allocation5] ss:$0 sm:$0xff]  ;;  %v1879_v27 = vpack.c.bf16 %v1074_v23, %v1073_v22  ;;  %v1076_v30 = vld [vmem:[#allocation11 + $0x18] sm:$0xff]  ;;  %v1078_v33 = vld [vmem:[#allocation11 + $0x28] sm:$0xff]  ;;  %s2590_s10 = smov 30   ;;  %s2591_s12 = smov 42  }
 0x15d   : > { %1868 = vmatpush3.bf16.msra.mxu1 %v1867_v17  ;;  %v1882_v31 = vpack.c.bf16 %v1076_v30, %v1075_v29  ;;  %v1077_v32 = vld [vmem:[#allocation11 + $0x20] sm:$0xff]  ;;  %v3056_v35 = vld [vmem:[#allocation16] sm:$0xff]  ;;  %v998_v37 = vld [vmem:[#allocation10 + $0x8] sm:$0xff]  ;;  %s2592_s13 = smov 125   ;;  %s2593_s20 = smov 122   ;;  %vm860_vm4 = vcmask 23552  }
 0x15e   : > { %1800 = vmatprep.subr.mxu1 %v2582_v9  ;;  %v1885_v34 = vpack.c.bf16 %v1078_v33, %v1077_v32  ;;  %866 = vrot.lane.b32.xlu1 %v3039_v14, %s2586_s15  ;;  %v997_v36 = vld [vmem:[#allocation10] sm:$0xff]  ;;  %v999_v39 = vld [vmem:[#allocation10 + $0x10] sm:$0xff]  ;;  %v1000_v40 = vld [vmem:[#allocation10 + $0x18] sm:$0xff]  ;;  %vm983_vm5 = vcmask 48128   ;;  %vm985_vm6 = vcmask 97280   ;;  %vm987_vm7 = vcmask 146432  }
 0x15f   : > { %1862 = vmatpush3.bf16.msra.mxu0 %v1861_v10  ;;  %v1870_v38 = vpack.c.bf16 %v998_v37, %v997_v36  ;;  %v1873_v43 = vpack.c.bf16 %v1000_v40, %v999_v39  ;;  %v1001_v44 = vld [vmem:[#allocation10 + $0x20] sm:$0xff]  ;;  %v1002_v45 = vld [vmem:[#allocation10 + $0x28] sm:$0xff]  ;;  %v1180_v55 = vld [vmem:[#allocation13 + $0x10] sm:$0xff]  ;;  %vm990_vm8 = vcmask 244736   ;;  %vm992_vm9 = vcmask 293888   ;;  %p3399_p3 = scmp.ne.s32.totalorder %s3380_s24, 0 }
 0x160   : > { %1863 = vmatprep.subr.bf16.mxu0 %v2580_v6  ;;  %v1876_v46 = vpack.c.bf16 %v1002_v45, %v1001_v44  ;;  %v1178_v49 = vld [vmem:[#allocation13] sm:$0xff]  ;;  %v1179_v50 = vld [vmem:[#allocation13 + $0x8] sm:$0xff]  ;;  %v1181_v56 = vld [vmem:[#allocation13 + $0x18] sm:$0xff]  ;;  %vm994_vm10 = vcmask 343040  }
 0x161   : > { %1801 = vmatpush3.msra.mxu1 %v748_v18  ;;  %v1286_v51 = vld [vmem:[#allocation14] sm:$0xff]  ;;  %v1888_v52 = vpack.c.bf16 %v1179_v50, %v1178_v49  ;;  %v1287_v53 = vld [vmem:[#allocation14 + $0x8] sm:$0xff]  ;;  %v1288_v57 = vld [vmem:[#allocation14 + $0x10] sm:$0xff]  ;;  %v1891_v58 = vpack.c.bf16 %v1181_v56, %v1180_v55 }
 0x162   : > { %1869 = vmatprep.subr.bf16.mxu1 %v2580_v6  ;;  %879 = vrot.lane.b32.xlu1 %v3039_v14, %s2588_s3  ;;  %v1894_v54 = vpack.c.bf16 %v1287_v53, %v1286_v51  ;;  %v1289_v59 = vld [vmem:[#allocation14 + $0x18] sm:$0xff] }
 0x163   : > { %1865 = vmatpush3.bf16.msra.mxu0 %v1864_v13  ;;  %v1897_v60 = vpack.c.bf16 %v1289_v59, %v1288_v57 }
 0x164   : > { %1878 = vmatprep.subr.bf16.mxu0 %v2580_v6 }
 0x166   : > { %901 = vrot.lane.b32.xlu1 %v3039_v14, %s2587_s28 }
 0x16a   : > { %914 = vrot.lane.b32.xlu1 %v3039_v14, %s2590_s10 }
 0x16e   : > { %936 = vrot.lane.b32.xlu1 %v3039_v14, %s2589_s23 }
 0x171   : > { %830 = vrot.lane.b32.xlu0 %v3039_v14, %s2583_s19 }
 0x172   : > { %949 = vrot.lane.b32.xlu1 %v3039_v14, %s2591_s12 }
 0x175   : > { %1158 = vrot.lane.b32.xlu0 %v3039_v14, %s2584_s1 }
 0x176   : > { %825 = vrot.lane.b32.xlu1 %v3056_v35, %s2585_s16 }
 0x179   : > { %839 = vrot.lane.b32.xlu0 %v3056_v35, %s2583_s19  ;;  %s2594_s19 = smov 110  }
 0x17a   : > { %862 = vrot.lane.b32.xlu1 %v3056_v35, %s2588_s3 }
 0x17d   : > { %875 = vrot.lane.b32.xlu0 %v3056_v35, %s2586_s15  ;;  %s2596_s15 = smov 86  }
 0x17e   : > { %897 = vrot.lane.b32.xlu1 %v3056_v35, %s2590_s10 }
 0x181   : > { %910 = vrot.lane.b32.xlu0 %v3056_v35, %s2587_s28  ;;  %s638_s28 = scalar_lea.vmem [#allocation22], %s3001_s11 }
 0x182   : > { %932 = vrot.lane.b32.xlu1 %v3056_v35, %s2591_s12 }
 0x185   : > { %945 = vrot.lane.b32.xlu0 %v3056_v35, %s2589_s23  ;;  %s2597_s23 = smov 12  }
 0x1cc   : > { %v844_v61 = vpop.permute.xlu1 %843 }
 0x1d0   : > { %v867_v62 = vpop.permute.xlu1 %866 }
 0x1d4   : > { %v880_v63 = vpop.permute.xlu1 %879 }
 0x1e8   : > { %v651_v19 = vpop.xlane.xlu0 %650 }
 0x1e9   : > { %v653_v20 = vmul.f32 0.020833334, %v651_v19 }
 0x1eb   : > { %v654_v21 = vadd.f32 1e-06, %v653_v20 }
 0x1ec   : > { %v831_v4 = vpop.permute.xlu0 %830 }
 0x1ed   : > { %2088 = vrsqrt.f32 %v654_v21 }
 0x1f0   : > { %v1159_v19 = vpop.permute.xlu0 %1158 }
 0x1f4   : > { %v840_v23 = vpop.permute.xlu0 %839 }
 0x1f7   : > { %v2089_v24 = vpop.eup %2088 }
 0x1f8   : > { %v656_v26 = vmul.f32 %v2089_v24, %v646_v0  ;;  %v902_v0 = vpop.permute.xlu1 %901 }
 0x1fa   : > { %v664_v28 = vmul.f32 %v1729_v25, %v656_v26  ;;  %v876_v25 = vpop.permute.xlu0 %875 }
 0x1fc   : > { %1794 = vmatmul.mubr.msk.f32.vlgmr.msra.gmra.mrb[0].mxu0 %vm648_vm0, %v664_v28  ;;  %v915_v5 = vpop.permute.xlu1 %914 }
 0x1fd   : > { %1880 = vmatpush3.bf16.msra.mxu0 %v1879_v27  ;;  %1832 = vmatprep.mubr.msk.f32.mxu0 %vm2581_vm1, %v2582_v9 }
 0x1fe   : > { %1881 = vmatprep.subr.bf16.mxu0 %v2580_v6  ;;  %v911_v27 = vpop.permute.xlu0 %910 }
 0x200   : > { %v937_v10 = vpop.permute.xlu1 %936 }
 0x201   : > { %1883 = vmatpush3.bf16.msra.mxu0 %v1882_v31 }
 0x202   : > { %1884 = vmatprep.subr.bf16.mxu0 %v2580_v6  ;;  %v946_v29 = vpop.permute.xlu0 %945 }
 0x204   : > { %v950_v16 = vpop.permute.xlu1 %949 }
 0x205   : > { %1886 = vmatpush3.bf16.msra.mxu0 %v1885_v34 }
 0x206   : > { %1893 = vmatprep.subr.bf16.mxu0 %v2580_v6 }
 0x208   : > { %1833 = vmatmul.mubr.msk.f32.vlgmr.msra.gmra.mrb[2].mxu0 %vm648_vm0, %v664_v28  ;;  %v826_v22 = vpop.permute.xlu1 %825 }
 0x209   : > { %1854 = vmatprep.mubr.msk.f32.mxu0 %vm2581_vm1, %v2582_v9  ;;  %1895 = vmatpush3.bf16.msra.mxu0 %v1894_v54 }
 0x20a   : > { %1896 = vmatprep.subr.bf16.mxu0 %v2580_v6 }
 0x20c   : > { %v863_v24 = vpop.permute.xlu1 %862 }
 0x20d   : > { %1898 = vmatpush3.bf16.msra.mxu0 %v1897_v60 }
 0x210   : > { %v898_v26 = vpop.permute.xlu1 %897 }
 0x2cf   : > { %v742_v41 = vpop.f32.mrb[0].mxu0 }
 0x2d0   : > { %v1795_v42 = vpop.f32.mrb[1].mxu0  ;;  %1803 = vmatmul.mubr.msk.f32.vlgmr.msra.gmra.mrb[0].mxu1 %vm749_vm2, %v742_v41 }
 0x2d1   : > { %1871 = vmatpush3.bf16.msra.mxu1 %v1870_v38  ;;  %1817 = vmatprep.mubr.msk.f32.mxu1 %vm2581_vm1, %v2582_v9 }
 0x2d2   : > { %1872 = vmatprep.subr.bf16.mxu1 %v2580_v6 }
 0x2d5   : > { %1874 = vmatpush3.bf16.msra.mxu1 %v1873_v43 }
 0x2d6   : > { %1875 = vmatprep.subr.bf16.mxu1 %v2580_v6 }
 0x2d9   : > { %1877 = vmatpush3.bf16.msra.mxu1 %v1876_v46 }
 0x2da   : > { %1887 = vmatprep.subr.bf16.mxu1 %v2580_v6 }
 0x2db   : > { %v3088_v47 = vpop.f32.mrb[2].mxu0 }
 0x2dc   : > { %1818 = vmatmul.mubr.msk.f32.vlgmr.msra.gmra.mrb[2].mxu1 %vm648_vm0, %v664_v28  ;;  %v1834_v48 = vpop.f32.mrb[3].mxu0  ;;  %v1161_v20 = vmul.f32 %v1159_v19, %v3088_v47  ;;  %v1171_v21 = vmul.f32 %v3088_v47, %v3039_v14  ;;  %v933_v28 = vpop.permute.xlu1 %932 }
 0x2dd   : > { %1843 = vmatprep.mubr.msk.f32.mxu1 %vm2581_vm1, %v2582_v9  ;;  %1889 = vmatpush3.bf16.msra.mxu1 %v1888_v52 }
 0x2de   : > { %1890 = vmatprep.subr.bf16.mxu1 %v2580_v6 }
 0x2e1   : > { %1892 = vmatpush3.bf16.msra.mxu1 %v1891_v58  ;;  %v1157_v58 = vmul.f32 %v3088_v47, %v3056_v35 }
 0x3a3   : > { %v819_v1 = vpop.f32.mrb[0].mxu1 }
 0x3a4   : > { %v3095_v2 = vmul.f32 0.28867513, %v819_v1  ;;  %v1804_v3 = vpop.f32.mrb[1].mxu1 }
 0x3a6   : > { %v846_v7 = vmul.f32 %v844_v61, %v3095_v2  ;;  %v833_v8 = vmul.f32 %v831_v4, %v3095_v2  ;;  %v882_v6 = vmul.f32 %v880_v63, %v3095_v2  ;;  %v869_v9 = vmul.f32 %v867_v62, %v3095_v2 }
 0x3a7   : > { %v917_v12 = vmul.f32 %v915_v5, %v3095_v2  ;;  %v904_v13 = vmul.f32 %v902_v0, %v3095_v2  ;;  %v952_v17 = vmul.f32 %v950_v16, %v3095_v2  ;;  %v939_v18 = vmul.f32 %v937_v10, %v3095_v2 }
 0x3a8   : > { %848 = vrot.lane.b32.xlu0 %v846_v7, %s2584_s1  ;;  %835 = vrot.lane.b32.xlu1 %v833_v8, %s2592_s13  ;;  %v828_v30 = vmul.f32 %v826_v22, %v3095_v2  ;;  %v842_v31 = vmul.f32 %v840_v23, %v3095_v2  ;;  %v865_v14 = vmul.f32 %v863_v24, %v3095_v2 }
 0x3a9   : > { %v878_v37 = vmul.f32 %v876_v25, %v3095_v2  ;;  %v900_v42 = vmul.f32 %v898_v26, %v3095_v2  ;;  %v913_v43 = vmul.f32 %v911_v27, %v3095_v2  ;;  %v935_v49 = vmul.f32 %v933_v28, %v3095_v2 }
 0x3aa   : > { %v948_v50 = vmul.f32 %v946_v29, %v3095_v2 }
 0x3ac   : > { %884 = vrot.lane.b32.xlu0 %v882_v6, %s2584_s1  ;;  %871 = vrot.lane.b32.xlu1 %v869_v9, %s2592_s13 }
 0x3af   : > { %v3103_v11 = vpop.f32.mrb[2].mxu1 }
 0x3b0   : > { %v1819_v15 = vpop.f32.mrb[3].mxu1  ;;  %1844 = vmatmul.mubr.msk.f32.vlgmr.msra.gmra.mrb[4].mxu1 %vm1153_vm3, %v3103_v11  ;;  %1855 = vmatmul.mubr.msk.f32.vlgmr.msra.gmra.mrb[4].mxu0 %vm1153_vm3, %v3103_v11 }
 0x3b1   : > { %919 = vrot.lane.b32.xlu0 %v917_v12, %s2584_s1  ;;  %906 = vrot.lane.b32.xlu1 %v904_v13, %s2592_s13 }
 0x3b5   : > { %954 = vrot.lane.b32.xlu0 %v952_v17, %s2584_s1  ;;  %941 = vrot.lane.b32.xlu1 %v939_v18, %s2592_s13 }
 0x3b9   : > { %1167 = vrot.lane.b32.xlu1 %v3056_v35, %s2584_s1  ;;  %1163 = vrot.lane.b32.xlu0 %v1161_v20, %s2592_s13  ;;  %s2598_s13 = smov 32  }
 0x3bd   : > { %1173 = vrot.lane.b32.xlu1 %v1171_v21, %s2584_s1  ;;  %s2595_s1 = smov 98  }
 0x41a   : > { %v836_v32 = vpop.permute.xlu1 %835  ;;  %v849_v33 = vpop.permute.xlu0 %848 }
 0x41b   : > { %v838_v34 = vsub.f32 %v828_v30, %v836_v32  ;;  %v851_v36 = vadd.f32 %v849_v33, %v842_v31 }
 0x41d   : > { %853 = vrot.lane.b32.xlu0 %v838_v34, %s2593_s20  ;;  %857 = vrot.lane.b32.xlu1 %v851_v36, %s2593_s20 }
 0x41e   : > { %v872_v38 = vpop.permute.xlu1 %871  ;;  %v885_v39 = vpop.permute.xlu0 %884 }
 0x41f   : > { %v874_v40 = vsub.f32 %v865_v14, %v872_v38  ;;  %v887_v41 = vadd.f32 %v885_v39, %v878_v37 }
 0x421   : > { %889 = vrot.lane.b32.xlu0 %v874_v40, %s2594_s19  ;;  %893 = vrot.lane.b32.xlu1 %v887_v41, %s2594_s19  ;;  %s1419_s19 = sshll.u32 %s638_s28, 4  ;;  %s3180_s19 = int_to_ptr.vmem [resolvable:$true] %s1419_s19 }
 0x423   : > { %v907_v44 = vpop.permute.xlu1 %906  ;;  %v920_v45 = vpop.permute.xlu0 %919 }
 0x424   : > { %v909_v46 = vsub.f32 %v900_v42, %v907_v44  ;;  %v922_v48 = vadd.f32 %v920_v45, %v913_v43 }
 0x426   : > { %924 = vrot.lane.b32.xlu0 %v909_v46, %s2595_s1  ;;  %928 = vrot.lane.b32.xlu1 %v922_v48, %s2595_s1  ;;  %s2599_s1 = smov [#allocation20]  }
 0x427   : > { %v942_v51 = vpop.permute.xlu1 %941  ;;  %v955_v52 = vpop.permute.xlu0 %954  ;;  %s2376_s4 = sshll.u32 %s2599_s1, 4  ;;  %s2377_s4 = int_to_ptr.vmem [resolvable:$false] %s2376_s4 }
 0x428   : > { %v944_v53 = vsub.f32 %v935_v49, %v942_v51  ;;  %v957_v54 = vadd.f32 %v955_v52, %v948_v50  ;;  %s2378_s5 = scalar_lea.vmem %s2377_s4, 256 }
 0x42a   : > { %959 = vrot.lane.b32.xlu0 %v944_v53, %s2596_s15  ;;  %963 = vrot.lane.b32.xlu1 %v957_v54, %s2596_s15  ;;  %s3397_s15 = sld [smem:[#allocation45_spill]] }
 0x42b   : > { %v1168_v55 = vpop.permute.xlu1 %1167  ;;  %v1164_v56 = vpop.permute.xlu0 %1163 }
 0x42c   : > { %v1170_v57 = vmul.f32 %v1168_v55, %v3088_v47  ;;  %v1166_v60 = vsub.f32 %v1157_v58, %v1164_v56 }
 0x42f   : > { %v1174_v59 = vpop.permute.xlu1 %1173 }
 0x430   : > { %v1176_v61 = vadd.f32 %v1174_v59, %v1170_v57 }
 0x432   : > { %v1177_v62 = vsel %vm860_vm4, %v1166_v60, %v1176_v61 }
 0x433   : > { %1263 = vrot.lane.b32.xlu1 %v1177_v62, %s2588_s3  ;;  %1256 = vrot.lane.b32.xlu0 %v1177_v62, %s2585_s16 }
 0x437   : > { %1275 = vrot.lane.b32.xlu1 %v1177_v62, %s2591_s12  ;;  %1269 = vrot.lane.b32.xlu0 %v1177_v62, %s2590_s10 }
 0x483   : > { %v1251_v63 = vpop.f32.mrb[4].mxu1  ;;  %v1356_v0 = vpop.f32.mrb[4].mxu0 }
 0x484   : > { %1360 = vst.msk [vmem:[%s638_s28] sm:$0xff] %vm648_vm0, %v1356_v0  ;;  %v1845_v35 = vpop.f32.mrb[5].mxu1  ;;  %v1856_v1 = vpop.f32.mrb[5].mxu0  ;;  %1266 = vrot.lane.b32.xlu1 %v1251_v63, %s2597_s23  ;;  %1260 = vrot.lane.b32.xlu0 %v1251_v63, %s2585_s16 }
 0x488   : > { %1272 = vrot.lane.b32.xlu0 %v1251_v63, %s2588_s3 }
 0x48f   : > { %v858_v3 = vpop.permute.xlu1 %857  ;;  %v854_v4 = vpop.permute.xlu0 %853 }
 0x490   : > { %v861_v5 = vsel %vm860_vm4, %v854_v4, %v858_v3 }
 0x491   : > { %968 = vrot.lane.b32.xlu1 %v861_v5, %s2585_s16  ;;  %s3396_s16 = sld [smem:[#allocation34_spill]] }
 0x493   : > { %v894_v7 = vpop.permute.xlu1 %893  ;;  %v890_v8 = vpop.permute.xlu0 %889 }
 0x494   : > { %v896_v6 = vsel %vm860_vm4, %v890_v8, %v894_v7 }
 0x495   : > { %972 = vrot.lane.b32.xlu0 %v896_v6, %s2588_s3  ;;  %s1366_s3 = sand.u32 1, %s2704_s14  }
 0x496   : > { %s3183_s2 = scalar_lea.sflag [#allocation21], %s1366_s3 }
 0x498   : > { %v929_v9 = vpop.permute.xlu1 %928  ;;  %v925_v10 = vpop.permute.xlu0 %924 }
 0x499   : > { %v931_v12 = vsel %vm860_vm4, %v925_v10, %v929_v9 }
 0x49a   : > { %976 = vrot.lane.b32.xlu1 %v931_v12, %s2590_s10  ;;  %s3157_s10 = sshll.u32 %s3396_s16, 7  ;;  %s3398_s16 = sld [smem:[#allocation46_spill]] }
 0x49b   : > { %s3169_s23 = scalar_lea.hbm %s3397_s15, %s3157_s10 }
 0x49c   : > { %v964_v13 = vpop.permute.xlu1 %963  ;;  %v960_v15 = vpop.permute.xlu0 %959 }
 0x49d   : > { %v966_v16 = vsel %vm860_vm4, %v960_v15, %v964_v13 }
 0x49e   : > { %1150 = vrot.lane.b32.xlu1 %v3088_v47, %s2598_s13  ;;  %980 = vrot.lane.b32.xlu0 %v966_v16, %s2591_s12  ;;  %s631_s12 = scalar_lea.vmem [#allocation20], %s3001_s11 }
 0x49f   : > { %s1405_s20 = sshll.u32 %s631_s12, 4  ;;  %s3171_s20 = int_to_ptr.vmem [resolvable:$true] %s1405_s20 }
 0x4a0   : > { %s3178_s0 = scalar_lea.hbm %s3398_s16, %s3157_s10  ;;  %s2372_s14 = scalar_lea.vmem %s3171_s20, 128 }
 0x4a1   : > { %p2373_p1 = scmp.ne.s32.totalorder %s3171_s20, %s2372_s14  ;;  %p2379_p13 = scmp.lt.s32.totalorder %s3171_s20, %s2377_s4 }
 0x4a2   : > { %p2380_p2 = scmp.lt.s32.totalorder %s2378_s5, %s2372_s14 }
 0x4a3   : > { %p2374_p10 = pnand %p2373_p1, %p3399_p3 }
 0x4a4   : > { %p2381_p5 = por %p2380_p2, %p2379_p13 }
 0x4a5   : > { %v1257_v17 = vpop.permute.xlu0 %1256  ;;  %v1264_v18 = vpop.permute.xlu1 %1263  ;;  %p2375_p4 = pneg %p2374_p10 }
 0x4a6   : > { %v1278_v21 = vsel %vm983_vm5, %v1251_v63, %v1257_v17 }
 0x4a7   : > { %p2382_p7 = pnand %p2381_p5, %p2375_p4 }
 0x4a9   : > { %v1270_v19 = vpop.permute.xlu0 %1269  ;;  %v1276_v20 = vpop.permute.xlu1 %1275 }
 0x4f6   : > { %v1261_v22 = vpop.permute.xlu0 %1260  ;;  %v1267_v47 = vpop.permute.xlu1 %1266 }
 0x4f7   : > { %v1279_v23 = vsel %vm985_vm6, %v1278_v21, %v1261_v22 }
 0x4f8   : > { %v1280_v24 = vsel %vm987_vm7, %v1279_v23, %v1264_v18 }
 0x4f9   : > { %v1281_v25 = vsel %vm749_vm2, %v1280_v24, %v1267_v47 }
 0x4fa   : > { %v1282_v26 = vsel %vm990_vm8, %v1281_v25, %v1270_v19  ;;  %v1273_v27 = vpop.permute.xlu0 %1272 }
 0x4fb   : > { %v1283_v28 = vsel %vm992_vm9, %v1282_v26, %v1273_v27 }
 0x4fc   : > { %v1284_v29 = vsel %vm994_vm10, %v1283_v28, %v1276_v20 }
 0x4fd   : > { %1285 = vst.msk [vmem:[%s631_s12] sm:$0xff] %vm648_vm0, %v1284_v29 }
 0x4fe   : > { %2385 = shalt.err (!%p2382_p7)
}
 0x4ff   : > { %s2386_s3 = scalar_lea.hbm %s3169_s23, 128  ;;  %s2390_s13 = scalar_lea.hbm %s3397_s15, 256 }
 0x500   : > { %p2387_p11 = scmp.ne.s32.totalorder %s3169_s23, %s2386_s3  ;;  %p2391_p0 = scmp.lt.u32.totalorder %s3169_s23, %s3397_s15 }
 0x501   : > { %p2392_p8 = scmp.lt.u32.totalorder %s2390_s13, %s2386_s3  ;;  %p2394_p1 = scmp.lt.u32.totalorder %s2386_s3, %s3169_s23 }
 0x502   : > { %p2388_p12 = pnand %p2387_p11, %p3399_p3 }
 0x503   : > { %p2393_p9 = por %p2392_p8, %p2391_p0 }
 0x504   : > { %p2389_p6 = pneg %p2388_p12 }
 0x505   : > { %p2395_p10 = por %p2394_p1, %p2393_p9 }
 0x507   : > { %p2396_p4 = pnand %p2395_p10, %p2389_p6 }
 0x509   : > { %2399 = shalt.err (!%p2396_p4)
}
 0x50a   : > { %1938 = dma.vmem_to_hbm [thread:$0]  (%p3399_p3), %s3171_s20, 128, %s3169_s23, %s3183_s2  }
 0x50b   : > { %s2400_s5 = scalar_lea.vmem %s3180_s19, 128  ;;  %s2600_s14 = smov [#allocation22]  }
 0x50c   : > { %p2401_p13 = scmp.ne.s32.totalorder %s3180_s19, %s2400_s5  ;;  %s2404_s3 = sshll.u32 %s2600_s14, 4  ;;  %s2405_s3 = int_to_ptr.vmem [resolvable:$false] %s2404_s3 }
 0x50d   : > { %s2406_s12 = scalar_lea.vmem %s2405_s3, 256  ;;  %p2407_p7 = scmp.lt.s32.totalorder %s3180_s19, %s2405_s3 }
 0x50e   : > { %p2402_p2 = pnand %p2401_p13, %p3399_p3  ;;  %p2408_p11 = scmp.lt.s32.totalorder %s2406_s12, %s2400_s5 }
 0x510   : > { %p2403_p5 = pneg %p2402_p2  ;;  %p2409_p12 = por %p2408_p11, %p2407_p7 }
 0x512   : > { %p2410_p6 = pnand %p2409_p12, %p2403_p5 }
 0x514   : > { %2413 = shalt.err (!%p2410_p6)
}
 0x515   : > { %s2414_s20 = scalar_lea.hbm %s3178_s0, 128  ;;  %s2418_s13 = scalar_lea.hbm %s3398_s16, 256 }
 0x516   : > { %p2415_p0 = scmp.ne.s32.totalorder %s3178_s0, %s2414_s20  ;;  %p2419_p1 = scmp.lt.u32.totalorder %s3178_s0, %s3398_s16 }
 0x517   : > { %p2420_p10 = scmp.lt.u32.totalorder %s2418_s13, %s2414_s20  ;;  %p2422_p13 = scmp.lt.u32.totalorder %s2414_s20, %s3178_s0 }
 0x518   : > { %p2416_p8 = pnand %p2415_p0, %p3399_p3 }
 0x519   : > { %p2421_p4 = por %p2420_p10, %p2419_p1 }
 0x51a   : > { %p2417_p9 = pneg %p2416_p8 }
 0x51b   : > { %p2423_p2 = por %p2422_p13, %p2421_p4 }
 0x51d   : > { %p2424_p5 = pnand %p2423_p2, %p2417_p9 }
 0x51f   : > { %2427 = shalt.err (!%p2424_p5)
}
 0x520   : > { %1939 = dma.vmem_to_hbm [thread:$0]  (%p3399_p3), %s3180_s19, 128, %s3178_s0, %s3183_s2   ;;  %v969_v30 = vpop.permute.xlu1 %968  ;;  %v973_v32 = vpop.permute.xlu0 %972  ;;  %vm1155_vm11 = vcmask 310272  }
 0x521   : > { %v984_v31 = vsel %vm983_vm5, %v3095_v2, %v969_v30  ;;  %s624_s5 = scalar_lea.vmem [#allocation19], %s3001_s11  ;;  %s645_s2 = scalar_lea.vmem [#allocation23], %s3001_s11 }
 0x522   : > { %v986_v33 = vsel %vm985_vm6, %v984_v31, %v3095_v2  ;;  %s1391_s0 = sshll.u32 %s624_s5, 4  ;;  %s1433_s19 = sshll.u32 %s645_s2, 4  ;;  %s3247_s0 = int_to_ptr.vmem [resolvable:$true] %s1391_s0  ;;  %s3258_s19 = int_to_ptr.vmem [resolvable:$true] %s1433_s19 }
 0x523   : > { %v988_v34 = vsel %vm987_vm7, %v986_v33, %v973_v32  ;;  %s3400_s12 = sld [smem:[#allocation44_spill]]  ;;  %s3401_s28 = sld [smem:[#allocation47_spill]] }
 0x524   : > { %v977_v36 = vpop.permute.xlu1 %976  ;;  %v989_v14 = vsel %vm749_vm2, %v988_v34, %v3095_v2  ;;  %v981_v40 = vpop.permute.xlu0 %980  ;;  %s1362_s4 = scalar_lea.sflag [#allocation4], %s2998_s17  ;;  %s2428_s14 = scalar_lea.vmem %s3247_s0, 128 }
 0x525   : > { %v991_v37 = vsel %vm990_vm8, %v989_v14, %v977_v36  ;;  %p2429_p7 = scmp.ne.s32.totalorder %s3247_s0, %s2428_s14  ;;  %s2601_s3 = smov [#allocation19]  }
 0x526   : > { %v993_v39 = vsel %vm992_vm9, %v991_v37, %v3095_v2  ;;  %s2432_s6 = sshll.u32 %s2601_s3, 4  ;;  %s2433_s6 = int_to_ptr.vmem [resolvable:$false] %s2432_s6 }
 0x527   : > { %v995_v42 = vsel %vm994_vm10, %v993_v39, %v981_v40  ;;  %p2430_p11 = pnand %p2429_p7, %p3399_p3  ;;  %s2434_s7 = scalar_lea.vmem %s2433_s6, 256 }
 0x528   : > { %v1151_v38 = vpop.permute.xlu1 %1150  ;;  %996 = vst.msk [vmem:[%s624_s5] sm:$0xff] %vm648_vm0, %v995_v42  ;;  %p2435_p6 = scmp.lt.s32.totalorder %s3247_s0, %s2433_s6  ;;  %p2436_p0 = scmp.lt.s32.totalorder %s2434_s7, %s2428_s14 }
 0x529   : > { %s3243_s20 = scalar_lea.hbm %s3400_s12, %s3157_s10  ;;  %v1154_v41 = vsel %vm1153_vm3, %v3103_v11, %v1151_v38  ;;  %s3402_s13 = smov %s3401_s28 }
 0x52a   : > { %s3256_s1 = scalar_lea.hbm %s3401_s28, %s3157_s10  ;;  %1156 = vst.msk [vmem:[%s645_s2] sm:$0xff] %vm1155_vm11, %v1154_v41  ;;  %p2431_p12 = pneg %p2430_p11 }
 0x52b   : > { %p2437_p8 = por %p2436_p0, %p2435_p6 }
 0x52d   : > { %p2438_p9 = pnand %p2437_p8, %p2431_p12 }
 0x52f   : > { %2441 = shalt.err (!%p2438_p9)
}
 0x530   : > { %s2442_s10 = scalar_lea.hbm %s3243_s20, 128  ;;  %s2446_s11 = scalar_lea.hbm %s3400_s12, 256 }
 0x531   : > { %p2443_p1 = scmp.ne.s32.totalorder %s3243_s20, %s2442_s10  ;;  %p2447_p13 = scmp.lt.u32.totalorder %s3243_s20, %s3400_s12 }
 0x532   : > { %p2448_p2 = scmp.lt.u32.totalorder %s2446_s11, %s2442_s10  ;;  %p2450_p7 = scmp.lt.u32.totalorder %s2442_s10, %s3243_s20 }
 0x533   : > { %p2444_p10 = pnand %p2443_p1, %p3399_p3 }
 0x534   : > { %p2449_p5 = por %p2448_p2, %p2447_p13 }
 0x535   : > { %p2445_p4 = pneg %p2444_p10 }
 0x536   : > { %p2451_p11 = por %p2450_p7, %p2449_p5 }
 0x538   : > { %p2452_p12 = pnand %p2451_p11, %p2445_p4 }
 0x53a   : > { %2455 = shalt.err (!%p2452_p12)
}
 0x53b   : > { %1937 = dma.vmem_to_hbm [thread:$0]  (%p3399_p3), %s3247_s0, 128, %s3243_s20, %s1362_s4  }
 0x53c   : > { %s1377_s7 = scalar_lea.sflag [#allocation24], %s2998_s17  ;;  %s2456_s28 = scalar_lea.vmem %s3258_s19, 128 }
 0x53d   : > { %p2457_p6 = scmp.ne.s32.totalorder %s3258_s19, %s2456_s28  ;;  %s2602_s14 = smov [#allocation23]  }
 0x53e   : > { %s2460_s3 = sshll.u32 %s2602_s14, 4  ;;  %s2461_s3 = int_to_ptr.vmem [resolvable:$false] %s2460_s3 }
 0x53f   : > { %p2458_p0 = pnand %p2457_p6, %p3399_p3  ;;  %s2462_s10 = scalar_lea.vmem %s2461_s3, 256 }
 0x540   : > { %p2463_p9 = scmp.lt.s32.totalorder %s3258_s19, %s2461_s3  ;;  %p2464_p1 = scmp.lt.s32.totalorder %s2462_s10, %s2456_s28 }
 0x541   : > { %p2459_p8 = pneg %p2458_p0 }
 0x542   : > { %p2465_p10 = por %p2464_p1, %p2463_p9 }
 0x544   : > { %p2466_p4 = pnand %p2465_p10, %p2459_p8 }
 0x546   : > { %2469 = shalt.err (!%p2466_p4)
}
 0x547   : > { %s2470_s17 = scalar_lea.hbm %s3256_s1, 128  ;;  %s2474_s4 = scalar_lea.hbm %s3402_s13, 256 }
 0x548   : > { %p2471_p13 = scmp.ne.s32.totalorder %s3256_s1, %s2470_s17  ;;  %p2475_p7 = scmp.lt.u32.totalorder %s3256_s1, %s3402_s13 }
 0x549   : > { %p2476_p11 = scmp.lt.u32.totalorder %s2474_s4, %s2470_s17  ;;  %p2478_p6 = scmp.lt.u32.totalorder %s2470_s17, %s3256_s1 }
 0x54a   : > { %p2472_p2 = pnand %p2471_p13, %p3399_p3 }
 0x54b   : > { %p2477_p12 = por %p2476_p11, %p2475_p7 }
 0x54c   : > { %p2473_p5 = pneg %p2472_p2 }
 0x54d   : > { %p2479_p0 = por %p2478_p6, %p2477_p12 }
 0x54f   : > { %p2480_p8 = pnand %p2479_p0, %p2473_p5 }
 0x551   : > { %2483 = shalt.err (!%p2480_p8)
}
 0x552   : > { %1940 = dma.vmem_to_hbm [thread:$0]  (%p3399_p3), %s3258_s19, 128, %s3256_s1, %s1377_s7  }
 0x553 PF: > { %s1445_s11 = sand.u32 1, %s2546_s25   ;;  %p3403_p9 = scmp.ne.s32.totalorder %s3381_s22, 0 }
 0x554   : > { %p3404_p1 = scmp.ge.s32.totalorder %s2566_s30, 2  ;;  %s1446_s23 = scalar_lea.sflag [#allocation4], %s1445_s11 }
 0x556   : > { %p1978_p10 = pnand %p3404_p1, %p3403_p9 }
 0x558   : > { %2533 = dma.done.wait (!%p1978_p10), %s1446_s23, 128  }
 0x559   : > { %2535 = vsyncadd (!%p1978_p10), %s1446_s23, 4294967168  ;;  %s3405_s6 = sadd.s32 4294967294, %s2566_s30  }
 0x55a   : > { %s1454_s28 = sand.u32 1, %s3405_s6  }
 0x55b   : > { %s1455_s14 = scalar_lea.sflag [#allocation21], %s1454_s28 }
 0x55c   : > { %2537 = dma.done.wait (!%p1978_p10), %s1455_s14, 256  }
 0x55d   : > { %2539 = vsyncadd (!%p1978_p10), %s1455_s14, 4294967040  ;;  %s1473_s24 = scalar_lea.sflag [#allocation24], %s1445_s11 }
 0x55e   : > { %2541 = dma.done.wait (!%p1978_p10), %s1473_s24, 128  }
 0x55f   : > { %2543 = vsyncadd (!%p1978_p10), %s1473_s24, 4294967168  ;;  %s41_s30 = sadd.s32 1, %s2566_s30   ;;  %s3406_s25 = smov %s2550_s26 }
 0x560   : > { %p38_p3 = scmp.ge.s32.totalorder %s41_s30, 4   ;;  %s3407_s26 = smov %s2554_s27 }
 0x561   : > { %s3408_s27 = smov %s2949_s21  ;;  %s3409_s28 = smov %s2562_s29 }
 0x562   : > { %s3410_s29 = smov %s3412_s18  ;;  %40 = sbr.rel (!%p38_p3) target bundleno = 28 (0x1c), region = 192 }
 0x569   :  { %1478 = vsyncpa [#allocation3], 1 }
 0x56a   :  { %1480 = vsyncpa [#allocation3 + $0x1], 1 }
 0x56b   :  { %1481 = vsyncpa [#allocation6], 1 }
 0x56c   :  { %1482 = vsyncpa [#allocation9], 1 }
 0x56d   :  { %1483 = vsyncpa [#allocation12], 1 }
 0x56e   :  { %1484 = vsyncpa [#allocation15], 1 }
 0x56f   :  { %1485 = vsyncpa [#allocation18], 1 }
 0x570   :  { %1486 = vsyncpa [#allocation4], 1 }
 0x571   :  { %1488 = vsyncpa [#allocation4 + $0x1], 1 }
 0x572   :  { %1489 = vsyncpa [#allocation21], 1 }
 0x573   :  { %1491 = vsyncpa [#allocation21 + $0x1], 1 }
 0x574   :  { %1492 = vsyncpa [#allocation24], 1 }
 0x575   :  { %1494 = vsyncpa [#allocation24 + $0x1], 1 }

</bundles_post_ra>
